<compile_context>
chip_gen: v7x
topology: tpu7x:2x2x1
jax: 0.10.0
libtpu: 0.0.40
codegen_flags: <defaults>
</compile_context>

<pallas_src>
import jax
import jax.numpy as jnp
from jax.experimental import pallas as pl
from jax.experimental.pallas import tpu as pltpu

# Synthetic cfg values (small, deterministic)
NZ      = 32   # cfg.GAN.Z_DIM
NGF     = 16   # cfg.GAN.NGF
NT      = 32   # cfg.TEXT.TXT_EMBEDDING_DIM
NUM_ELT = 15   # cfg.KEYPOINT.NUM_ELT
BATCH   = 8

LANES    = 128                      # uniform lane width for activations / weight blocks
N_BLOCKS = 8                        # 128x128 weight blocks (8 MXU dots, 6-deep chain)
FEAT_IN  = NZ + NT + NUM_ELT * 3    # 109 real input lanes
LOC_DIM  = NUM_ELT * 3              # 45


# ----------------------------------------------------------------------------- kernel
def _keygen_kernel(act_ref, b_ref, w_hbm, out_ref, wbuf, sem):
    # act_ref: (3, B, 128)   [0]=cat(noise,txts,f_locs) padded, [1]=maskOn, [2]=f_locs
    # b_ref:   (8, 1, 128)   per-block biases (sublane-broadcast in the VPU add)
    # w_hbm:   (8, 128, 128) packed weight blocks, left in HBM (manual DMA)
    # wbuf:    (2, 128, 128) VMEM double buffer
    # sem:     (2,)          DMA semaphores

    def fetch(i, slot):
        pltpu.make_async_copy(w_hbm.at[i], wbuf.at[slot], sem.at[slot]).start()

    def next_w(i):
        """Wait for block i (slot i&1), prefetch block i+1 into the other slot."""
        slot = i & 1
        pltpu.make_async_copy(w_hbm.at[0], wbuf.at[slot], sem.at[slot]).wait()
        if i + 1 < N_BLOCKS:
            fetch(i + 1, 1 - slot)
        return wbuf[slot]

    relu = lambda v: jnp.maximum(v, 0.0)
    dot = lambda a, w: jnp.dot(a, w, preferred_element_type=jnp.float32)

    fetch(0, 0)                      # prime slot 0
    x0 = act_ref[0]

    # blk0: fused z_enc | t_enc                    -> low = [z(64) | t(64)]
    low = relu(dot(x0, next_w(0)) + b_ref[0])
    # blk1: loc_enc layer 1 (BN folded)            -> h = [l1(64) | 0]
    h = relu(dot(x0, next_w(1)) + b_ref[1])
    # blk2: loc_enc layer 2 (BN folded)            -> h = [l2(32) | 0]
    h = relu(dot(h, next_w(2)) + b_ref[2])
    # blk3 + blk4: convG layer 1 (wg1 split along K at lane 128; bias added once)
    acc = dot(low, next_w(3))
    g = relu(acc + dot(h, next_w(4)) + b_ref[4])
    # blk5: convG layer 2 (BN folded)
    g = relu(dot(g, next_w(5)) + b_ref[5])
    # blk6: convG layer 3 (BN folded)
    g = relu(dot(g, next_w(6)) + b_ref[6])
    # blk7: convG layer 4 (no ReLU) + sigmoid
    y = jax.nn.sigmoid(dot(g, next_w(7)) + b_ref[7])

    # kg + kc = sigmoid(x) * maskOff + locs * maskOn  (padded lanes sliced off outside)
    mask_on = act_ref[1]
    out_ref[...] = y * (1.0 - mask_on) + act_ref[2] * mask_on


# -------------------------------------------------------------------------- parameters
def _linear(key, fan_in, fan_out):
    """PyTorch nn.Linear default init, stored as (in, out) for x @ W."""
    kw, kb = jax.random.split(key)
    bound = float(fan_in) ** -0.5
    w = jax.random.uniform(kw, (fan_in, fan_out), jnp.float32, -bound, bound)
    b = jax.random.uniform(kb, (1, fan_out), jnp.float32, -bound, bound)
    return w, b


def _bn_params(key, n):
    kg, kb, km, kv = jax.random.split(key, 4)
    gamma = jax.random.uniform(kg, (n,), jnp.float32, 0.5, 1.5)
    beta  = jax.random.uniform(kb, (n,), jnp.float32, -0.1, 0.1)
    mean  = jax.random.uniform(km, (n,), jnp.float32, -0.1, 0.1)
    var   = jax.random.uniform(kv, (n,), jnp.float32, 0.8, 1.2)
    return gamma, beta, mean, var


def _fold_bn(w, b, bn, eps=1e-5):
    """Fold eval-mode BatchNorm1d into the preceding Linear (exact)."""
    gamma, beta, mean, var = bn
    s = gamma / jnp.sqrt(var + eps)
    wf = w * s[None, :]
    bf = (b[0] - mean) * s + beta
    return wf, bf.reshape(1, -1)


def build_params(key):
    keys = jax.random.split(key, 13)
    wz, bz = _linear(keys[0], NZ, NGF * 4)
    wt, bt = _linear(keys[1], NT, NGF * 4)

    wl1, bl1 = _linear(keys[2], NUM_ELT * 3, NGF * 4)
    wl1, bl1 = _fold_bn(wl1, bl1, _bn_params(keys[3], NGF * 4))
    wl2, bl2 = _linear(keys[4], NGF * 4, NGF * 2)
    wl2, bl2 = _fold_bn(wl2, bl2, _bn_params(keys[5], NGF * 2))

    wg1, bg1 = _linear(keys[6], NGF * 10, NGF * 8)
    wg1, bg1 = _fold_bn(wg1, bg1, _bn_params(keys[7], NGF * 8))
    wg2, bg2 = _linear(keys[8], NGF * 8, NGF * 4)
    wg2, bg2 = _fold_bn(wg2, bg2, _bn_params(keys[9], NGF * 4))
    wg3, bg3 = _linear(keys[10], NGF * 4, NGF * 2)
    wg3, bg3 = _fold_bn(wg3, bg3, _bn_params(keys[11], NGF * 2))
    wg4, bg4 = _linear(keys[12], NGF * 2, NUM_ELT * 3)

    return (wz, bz, wt, bt, wl1, bl1, wl2, bl2,
            wg1, bg1, wg2, bg2, wg3, bg3, wg4, bg4)


# --------------------------------------------------------------- wrapper-side packing
def pack_params(params):
    """Pack the 8 Linear layers into (8, 128, 128) weight blocks + (8, 1, 128) biases."""
    (wz, bz, wt, bt, wl1, bl1, wl2, bl2,
     wg1, bg1, wg2, bg2, wg3, bg3, wg4, bg4) = params

    def blk(entries):
        m = jnp.zeros((LANES, LANES), jnp.float32)
        for r, c, w in entries:
            m = m.at[r:r + w.shape[0], c:c + w.shape[1]].set(w)
        return m

    def bias(entries):
        v = jnp.zeros((LANES,), jnp.float32)
        for c, b in entries:
            b = b.reshape(-1)
            v = v.at[c:c + b.shape[0]].set(b)
        return v

    H = NGF * 4   # 64
    # x0 lane layout: [0:32)=noise, [32:64)=txts, [64:109)=f_locs, rest 0
    w_blocks = [
        blk([(0, 0, wz), (NZ, H, wt)]),          # blk0: z_enc | t_enc  -> [z | t]
        blk([(NZ + NT, 0, wl1)]),                # blk1: loc_enc L1     -> [l1 | 0]
        blk([(0, 0, wl2)]),                      # blk2: loc_enc L2     -> [l2 | 0]
        blk([(0, 0, wg1[:LANES, :])]),           # blk3: wg1 rows [0:128)  (z|t part)
        blk([(0, 0, wg1[LANES:, :])]),           # blk4: wg1 rows [128:160) (l2 part)
        blk([(0, 0, wg2)]),                      # blk5: convG L2
        blk([(0, 0, wg3)]),                      # blk6: convG L3
        blk([(0, 0, wg4)]),                      # blk7: convG L4
    ]
    b_blocks = [
        bias([(0, bz), (H, bt)]),
        bias([(0, bl1)]),
        bias([(0, bl2)]),
        bias([]),                                # bg1 is applied with blk4 instead
        bias([(0, bg1)]),
        bias([(0, bg2)]),
        bias([(0, bg3)]),
        bias([(0, bg4)]),
    ]
    w_packed = jnp.stack(w_blocks)               # (8, 128, 128)  ~512 KiB f32
    b_packed = jnp.stack(b_blocks)[:, None, :]   # (8, 1, 128)    batch-size agnostic
    return w_packed, b_packed


# ----------------------------------------------------------------------------- wrapper
@jax.jit
def keygen_forward(noise, txts, locs, w_packed, b_packed):
    b = noise.shape[0]
    f_locs = locs.reshape(b, LOC_DIM)
    # maskOn = replicate(locs[:, :, -1]) broadcast across the 3 (x, y, on) channels
    mask_on = jnp.broadcast_to(locs[:, :, 2:3], (b, NUM_ELT, 3)).reshape(b, LOC_DIM)

    x0 = jnp.concatenate(
        [noise, txts, f_locs, jnp.zeros((b, LANES - FEAT_IN), jnp.float32)], axis=1)
    pad = jnp.zeros((b, LANES - LOC_DIM), jnp.float32)
    acts = jnp.stack([x0,
                      jnp.concatenate([mask_on, pad], axis=1),
                      jnp.concatenate([f_locs, pad], axis=1)])          # (3, B, 128)

    vmem = pl.BlockSpec(memory_space=pltpu.MemorySpace.VMEM)
    flops = 2 * b * LANES * LANES * N_BLOCKS
    bytes_accessed = 4 * (acts.size + w_packed.size + b_packed.size + b * LANES)

    out = pl.pallas_call(
        _keygen_kernel,
        out_shape=jax.ShapeDtypeStruct((b, LANES), jnp.float32),
        in_specs=[vmem,                                   # acts      -> VMEM
                  vmem,                                   # biases    -> VMEM
                  pl.BlockSpec(memory_space=pl.ANY)],     # weights   -> stay in HBM
        out_specs=vmem,
        scratch_shapes=[pltpu.VMEM((2, LANES, LANES), jnp.float32),
                        pltpu.SemaphoreType.DMA((2,))],
        cost_estimate=pl.CostEstimate(flops=flops,
                                      transcendentals=b * LANES,
                                      bytes_accessed=bytes_accessed),
    )(acts, b_packed, w_packed)
    # lane-dense (B, 128) result -> real 45 features
    return out[:, :LOC_DIM].reshape(b, NUM_ELT, 3)


# --------------------------------------------------------------------- pure-JAX reference
def reference_forward(noise, txts, locs, params):
    (wz, bz, wt, bt, wl1, bl1, wl2, bl2,
     wg1, bg1, wg2, bg2, wg3, bg3, wg4, bg4) = params
    b = noise.shape[0]
    relu = lambda v: jnp.maximum(v, 0.0)
    f_locs = locs.reshape(b, NUM_ELT * 3)
    z = relu(noise @ wz + bz)
    t = relu(txts @ wt + bt)
    l = relu(f_locs @ wl1 + bl1)
    l = relu(l @ wl2 + bl2)
    x = jnp.concatenate([z, t, l], axis=1)
    x = relu(x @ wg1 + bg1)
    x = relu(x @ wg2 + bg2)
    x = relu(x @ wg3 + bg3)
    x = x @ wg4 + bg4
    x = jax.nn.sigmoid(x).reshape(b, NUM_ELT, 3)
    mask_on = jnp.broadcast_to(locs[:, :, 2:3], (b, NUM_ELT, 3))
    return x * (1.0 - mask_on) + locs * mask_on


# -------------------------------------------------------------------------------- main
if __name__ == "__main__":
    key = jax.random.PRNGKey(0)
    k_noise, k_txt, k_xy, k_on, k_params = jax.random.split(key, 5)

    noise = jax.random.normal(k_noise, (BATCH, NZ), jnp.float32)
    txts  = jax.random.normal(k_txt, (BATCH, NT), jnp.float32)
    coords = jax.random.uniform(k_xy, (BATCH, NUM_ELT, 2), jnp.float32)
    onflag = (jax.random.uniform(k_on, (BATCH, NUM_ELT, 1)) > 0.3).astype(jnp.float32)
    locs = jnp.concatenate([coords, onflag], axis=-1)   # (B, NUM_ELT, 3)

    params = build_params(k_params)
    # One-time packing (precomputed / hoisted out of the step in real use).
    w_packed, b_packed = pack_params(params)

    out = keygen_forward(noise, txts, locs, w_packed, b_packed)
    jax.block_until_ready(out)

    ref = reference_forward(noise, txts, locs, params)
    max_err = float(jnp.max(jnp.abs(out - ref)))
    assert out.shape == (BATCH, NUM_ELT, 3)
    assert max_err < 1e-4, f"mismatch vs reference: {max_err}"

    print("KERNEL_OK")
</pallas_src>

<mosaic_0001>
module attributes {stable_mosaic.version = 11 : i64} {
  func.func @_keygen_kernel(%arg0: memref<3x8x128xf32, #tpu.memory_space<vmem>>, %arg1: memref<8x1x128xf32, #tpu.memory_space<vmem>>, %arg2: memref<8x128x128xf32, #tpu.memory_space<any>>, %arg3: memref<8x128xf32, #tpu.memory_space<vmem>>, %arg4: memref<2x128x128xf32, #tpu.memory_space<vmem>>, %arg5: memref<2x!tpu.dma_semaphore, #tpu.memory_space<semaphore_mem>>) attributes {dimension_semantics = [], scalar_prefetch = 0 : i64, scratch_operands = 2 : i64, tpu.core_type = #tpu.core_type<tc>} {
    %c0_i32 = arith.constant 0 : i32
    %c0_i32_0 = arith.constant 0 : i32
    %c0_i32_1 = arith.constant 0 : i32
    %c0_i32_2 = arith.constant 0 : i32
    %c0_i32_3 = arith.constant 0 : i32
    %0 = tpu.memref_slice %arg2[%c0_i32, %c0_i32_2, %c0_i32_3] : memref<8x128x128xf32, #tpu.memory_space<any>> -> memref<1x128x128xf32, #tpu.memory_space<any>>
    %1 = tpu.memref_squeeze %0 : memref<1x128x128xf32, #tpu.memory_space<any>> -> memref<128x128xf32, #tpu.memory_space<any>>
    %c0_i32_4 = arith.constant 0 : i32
    %c0_i32_5 = arith.constant 0 : i32
    %2 = tpu.memref_slice %arg4[%c0_i32_0, %c0_i32_4, %c0_i32_5] : memref<2x128x128xf32, #tpu.memory_space<vmem>> -> memref<1x128x128xf32, #tpu.memory_space<vmem>>
    %3 = tpu.memref_squeeze %2 : memref<1x128x128xf32, #tpu.memory_space<vmem>> -> memref<128x128xf32, #tpu.memory_space<vmem>>
    %4 = tpu.memref_slice %arg5[%c0_i32_1] : memref<2x!tpu.dma_semaphore, #tpu.memory_space<semaphore_mem>> -> memref<1x!tpu.dma_semaphore, #tpu.memory_space<semaphore_mem>>
    %5 = tpu.memref_squeeze %4 : memref<1x!tpu.dma_semaphore, #tpu.memory_space<semaphore_mem>> -> memref<!tpu.dma_semaphore, #tpu.memory_space<semaphore_mem>>
    tpu.enqueue_dma source(%1 : memref<128x128xf32, #tpu.memory_space<any>>) target(%3 : memref<128x128xf32, #tpu.memory_space<vmem>>) target_semaphore(%5 : memref<!tpu.dma_semaphore, #tpu.memory_space<semaphore_mem>>)
    %c0 = arith.constant 0 : index
    %c0_6 = arith.constant 0 : index
    %c0_7 = arith.constant 0 : index
    %6 = vector.load %arg0[%c0, %c0_6, %c0_7] : memref<3x8x128xf32, #tpu.memory_space<vmem>>, vector<1x8x128xf32>
    %7 = vector.shape_cast %6 : vector<1x8x128xf32> to vector<8x128xf32>
    %c0_i32_8 = arith.constant 0 : i32
    %c0_i32_9 = arith.constant 0 : i32
    %c0_i32_10 = arith.constant 0 : i32
    %c0_i32_11 = arith.constant 0 : i32
    %c0_i32_12 = arith.constant 0 : i32
    %8 = tpu.memref_slice %arg2[%c0_i32_8, %c0_i32_11, %c0_i32_12] : memref<8x128x128xf32, #tpu.memory_space<any>> -> memref<1x128x128xf32, #tpu.memory_space<any>>
    %9 = tpu.memref_squeeze %8 : memref<1x128x128xf32, #tpu.memory_space<any>> -> memref<128x128xf32, #tpu.memory_space<any>>
    %c0_i32_13 = arith.constant 0 : i32
    %c0_i32_14 = arith.constant 0 : i32
    %10 = tpu.memref_slice %arg4[%c0_i32_9, %c0_i32_13, %c0_i32_14] : memref<2x128x128xf32, #tpu.memory_space<vmem>> -> memref<1x128x128xf32, #tpu.memory_space<vmem>>
    %11 = tpu.memref_squeeze %10 : memref<1x128x128xf32, #tpu.memory_space<vmem>> -> memref<128x128xf32, #tpu.memory_space<vmem>>
    %12 = tpu.memref_slice %arg5[%c0_i32_10] : memref<2x!tpu.dma_semaphore, #tpu.memory_space<semaphore_mem>> -> memref<1x!tpu.dma_semaphore, #tpu.memory_space<semaphore_mem>>
    %13 = tpu.memref_squeeze %12 : memref<1x!tpu.dma_semaphore, #tpu.memory_space<semaphore_mem>> -> memref<!tpu.dma_semaphore, #tpu.memory_space<semaphore_mem>>
    tpu.wait_dma2 semaphore(%13 : memref<!tpu.dma_semaphore, #tpu.memory_space<semaphore_mem>>) src(%9 : memref<128x128xf32, #tpu.memory_space<any>>) dst(%11 : memref<128x128xf32, #tpu.memory_space<vmem>>)
    %c1_i32 = arith.constant 1 : i32
    %c1_i32_15 = arith.constant 1 : i32
    %c1_i32_16 = arith.constant 1 : i32
    %c0_i32_17 = arith.constant 0 : i32
    %c0_i32_18 = arith.constant 0 : i32
    %14 = tpu.memref_slice %arg2[%c1_i32, %c0_i32_17, %c0_i32_18] : memref<8x128x128xf32, #tpu.memory_space<any>> -> memref<1x128x128xf32, #tpu.memory_space<any>>
    %15 = tpu.memref_squeeze %14 : memref<1x128x128xf32, #tpu.memory_space<any>> -> memref<128x128xf32, #tpu.memory_space<any>>
    %c0_i32_19 = arith.constant 0 : i32
    %c0_i32_20 = arith.constant 0 : i32
    %16 = tpu.memref_slice %arg4[%c1_i32_15, %c0_i32_19, %c0_i32_20] : memref<2x128x128xf32, #tpu.memory_space<vmem>> -> memref<1x128x128xf32, #tpu.memory_space<vmem>>
    %17 = tpu.memref_squeeze %16 : memref<1x128x128xf32, #tpu.memory_space<vmem>> -> memref<128x128xf32, #tpu.memory_space<vmem>>
    %18 = tpu.memref_slice %arg5[%c1_i32_16] : memref<2x!tpu.dma_semaphore, #tpu.memory_space<semaphore_mem>> -> memref<1x!tpu.dma_semaphore, #tpu.memory_space<semaphore_mem>>
    %19 = tpu.memref_squeeze %18 : memref<1x!tpu.dma_semaphore, #tpu.memory_space<semaphore_mem>> -> memref<!tpu.dma_semaphore, #tpu.memory_space<semaphore_mem>>
    tpu.enqueue_dma source(%15 : memref<128x128xf32, #tpu.memory_space<any>>) target(%17 : memref<128x128xf32, #tpu.memory_space<vmem>>) target_semaphore(%19 : memref<!tpu.dma_semaphore, #tpu.memory_space<semaphore_mem>>)
    %c0_21 = arith.constant 0 : index
    %c0_22 = arith.constant 0 : index
    %c0_23 = arith.constant 0 : index
    %20 = vector.load %arg4[%c0_21, %c0_22, %c0_23] : memref<2x128x128xf32, #tpu.memory_space<vmem>>, vector<1x128x128xf32>
    %21 = vector.shape_cast %20 : vector<1x128x128xf32> to vector<128x128xf32>
    %cst = arith.constant dense<0.000000e+00> : vector<8x128xf32>
    %22 = tpu.matmul %7, %21, %cst {dimension_numbers = #tpu.dot_dimension_numbers<[1], [0], [0], [1], [0, 0, 1, 1], [], []>} : vector<8x128xf32>, vector<128x128xf32>, vector<8x128xf32> -> vector<8x128xf32>
    %c0_24 = arith.constant 0 : index
    %c0_25 = arith.constant 0 : index
    %c0_26 = arith.constant 0 : index
    %23 = vector.load %arg1[%c0_24, %c0_25, %c0_26] : memref<8x1x128xf32, #tpu.memory_space<vmem>>, vector<1x1x128xf32>
    %24 = vector.shape_cast %23 : vector<1x1x128xf32> to vector<1x128xf32>
    %25 = vector.broadcast %24 : vector<1x128xf32> to vector<8x128xf32>
    %26 = arith.addf %22, %25 : vector<8x128xf32>
    %cst_27 = arith.constant 0.000000e+00 : f32
    %27 = vector.broadcast %cst_27 : f32 to vector<8x128xf32>
    %28 = arith.maximumf %26, %27 : vector<8x128xf32>
    %c0_i32_28 = arith.constant 0 : i32
    %c1_i32_29 = arith.constant 1 : i32
    %c1_i32_30 = arith.constant 1 : i32
    %c0_i32_31 = arith.constant 0 : i32
    %c0_i32_32 = arith.constant 0 : i32
    %29 = tpu.memref_slice %arg2[%c0_i32_28, %c0_i32_31, %c0_i32_32] : memref<8x128x128xf32, #tpu.memory_space<any>> -> memref<1x128x128xf32, #tpu.memory_space<any>>
    %30 = tpu.memref_squeeze %29 : memref<1x128x128xf32, #tpu.memory_space<any>> -> memref<128x128xf32, #tpu.memory_space<any>>
    %c0_i32_33 = arith.constant 0 : i32
    %c0_i32_34 = arith.constant 0 : i32
    %31 = tpu.memref_slice %arg4[%c1_i32_29, %c0_i32_33, %c0_i32_34] : memref<2x128x128xf32, #tpu.memory_space<vmem>> -> memref<1x128x128xf32, #tpu.memory_space<vmem>>
    %32 = tpu.memref_squeeze %31 : memref<1x128x128xf32, #tpu.memory_space<vmem>> -> memref<128x128xf32, #tpu.memory_space<vmem>>
    %33 = tpu.memref_slice %arg5[%c1_i32_30] : memref<2x!tpu.dma_semaphore, #tpu.memory_space<semaphore_mem>> -> memref<1x!tpu.dma_semaphore, #tpu.memory_space<semaphore_mem>>
    %34 = tpu.memref_squeeze %33 : memref<1x!tpu.dma_semaphore, #tpu.memory_space<semaphore_mem>> -> memref<!tpu.dma_semaphore, #tpu.memory_space<semaphore_mem>>
    tpu.wait_dma2 semaphore(%34 : memref<!tpu.dma_semaphore, #tpu.memory_space<semaphore_mem>>) src(%30 : memref<128x128xf32, #tpu.memory_space<any>>) dst(%32 : memref<128x128xf32, #tpu.memory_space<vmem>>)
    %c2_i32 = arith.constant 2 : i32
    %c0_i32_35 = arith.constant 0 : i32
    %c0_i32_36 = arith.constant 0 : i32
    %c0_i32_37 = arith.constant 0 : i32
    %c0_i32_38 = arith.constant 0 : i32
    %35 = tpu.memref_slice %arg2[%c2_i32, %c0_i32_37, %c0_i32_38] : memref<8x128x128xf32, #tpu.memory_space<any>> -> memref<1x128x128xf32, #tpu.memory_space<any>>
    %36 = tpu.memref_squeeze %35 : memref<1x128x128xf32, #tpu.memory_space<any>> -> memref<128x128xf32, #tpu.memory_space<any>>
    %c0_i32_39 = arith.constant 0 : i32
    %c0_i32_40 = arith.constant 0 : i32
    %37 = tpu.memref_slice %arg4[%c0_i32_35, %c0_i32_39, %c0_i32_40] : memref<2x128x128xf32, #tpu.memory_space<vmem>> -> memref<1x128x128xf32, #tpu.memory_space<vmem>>
    %38 = tpu.memref_squeeze %37 : memref<1x128x128xf32, #tpu.memory_space<vmem>> -> memref<128x128xf32, #tpu.memory_space<vmem>>
    %39 = tpu.memref_slice %arg5[%c0_i32_36] : memref<2x!tpu.dma_semaphore, #tpu.memory_space<semaphore_mem>> -> memref<1x!tpu.dma_semaphore, #tpu.memory_space<semaphore_mem>>
    %40 = tpu.memref_squeeze %39 : memref<1x!tpu.dma_semaphore, #tpu.memory_space<semaphore_mem>> -> memref<!tpu.dma_semaphore, #tpu.memory_space<semaphore_mem>>
    tpu.enqueue_dma source(%36 : memref<128x128xf32, #tpu.memory_space<any>>) target(%38 : memref<128x128xf32, #tpu.memory_space<vmem>>) target_semaphore(%40 : memref<!tpu.dma_semaphore, #tpu.memory_space<semaphore_mem>>)
    %c1 = arith.constant 1 : index
    %c0_41 = arith.constant 0 : index
    %c0_42 = arith.constant 0 : index
    %41 = vector.load %arg4[%c1, %c0_41, %c0_42] : memref<2x128x128xf32, #tpu.memory_space<vmem>>, vector<1x128x128xf32>
    %42 = vector.shape_cast %41 : vector<1x128x128xf32> to vector<128x128xf32>
    %cst_43 = arith.constant dense<0.000000e+00> : vector<8x128xf32>
    %43 = tpu.matmul %7, %42, %cst_43 {dimension_numbers = #tpu.dot_dimension_numbers<[1], [0], [0], [1], [0, 0, 1, 1], [], []>} : vector<8x128xf32>, vector<128x128xf32>, vector<8x128xf32> -> vector<8x128xf32>
    %c1_44 = arith.constant 1 : index
    %c0_45 = arith.constant 0 : index
    %c0_46 = arith.constant 0 : index
    %44 = vector.load %arg1[%c1_44, %c0_45, %c0_46] : memref<8x1x128xf32, #tpu.memory_space<vmem>>, vector<1x1x128xf32>
    %45 = vector.shape_cast %44 : vector<1x1x128xf32> to vector<1x128xf32>
    %46 = vector.broadcast %45 : vector<1x128xf32> to vector<8x128xf32>
    %47 = arith.addf %43, %46 : vector<8x128xf32>
    %cst_47 = arith.constant 0.000000e+00 : f32
    %48 = vector.broadcast %cst_47 : f32 to vector<8x128xf32>
    %49 = arith.maximumf %47, %48 : vector<8x128xf32>
    %c0_i32_48 = arith.constant 0 : i32
    %c0_i32_49 = arith.constant 0 : i32
    %c0_i32_50 = arith.constant 0 : i32
    %c0_i32_51 = arith.constant 0 : i32
    %c0_i32_52 = arith.constant 0 : i32
    %50 = tpu.memref_slice %arg2[%c0_i32_48, %c0_i32_51, %c0_i32_52] : memref<8x128x128xf32, #tpu.memory_space<any>> -> memref<1x128x128xf32, #tpu.memory_space<any>>
    %51 = tpu.memref_squeeze %50 : memref<1x128x128xf32, #tpu.memory_space<any>> -> memref<128x128xf32, #tpu.memory_space<any>>
    %c0_i32_53 = arith.constant 0 : i32
    %c0_i32_54 = arith.constant 0 : i32
    %52 = tpu.memref_slice %arg4[%c0_i32_49, %c0_i32_53, %c0_i32_54] : memref<2x128x128xf32, #tpu.memory_space<vmem>> -> memref<1x128x128xf32, #tpu.memory_space<vmem>>
    %53 = tpu.memref_squeeze %52 : memref<1x128x128xf32, #tpu.memory_space<vmem>> -> memref<128x128xf32, #tpu.memory_space<vmem>>
    %54 = tpu.memref_slice %arg5[%c0_i32_50] : memref<2x!tpu.dma_semaphore, #tpu.memory_space<semaphore_mem>> -> memref<1x!tpu.dma_semaphore, #tpu.memory_space<semaphore_mem>>
    %55 = tpu.memref_squeeze %54 : memref<1x!tpu.dma_semaphore, #tpu.memory_space<semaphore_mem>> -> memref<!tpu.dma_semaphore, #tpu.memory_space<semaphore_mem>>
    tpu.wait_dma2 semaphore(%55 : memref<!tpu.dma_semaphore, #tpu.memory_space<semaphore_mem>>) src(%51 : memref<128x128xf32, #tpu.memory_space<any>>) dst(%53 : memref<128x128xf32, #tpu.memory_space<vmem>>)
    %c3_i32 = arith.constant 3 : i32
    %c1_i32_55 = arith.constant 1 : i32
    %c1_i32_56 = arith.constant 1 : i32
    %c0_i32_57 = arith.constant 0 : i32
    %c0_i32_58 = arith.constant 0 : i32
    %56 = tpu.memref_slice %arg2[%c3_i32, %c0_i32_57, %c0_i32_58] : memref<8x128x128xf32, #tpu.memory_space<any>> -> memref<1x128x128xf32, #tpu.memory_space<any>>
    %57 = tpu.memref_squeeze %56 : memref<1x128x128xf32, #tpu.memory_space<any>> -> memref<128x128xf32, #tpu.memory_space<any>>
    %c0_i32_59 = arith.constant 0 : i32
    %c0_i32_60 = arith.constant 0 : i32
    %58 = tpu.memref_slice %arg4[%c1_i32_55, %c0_i32_59, %c0_i32_60] : memref<2x128x128xf32, #tpu.memory_space<vmem>> -> memref<1x128x128xf32, #tpu.memory_space<vmem>>
    %59 = tpu.memref_squeeze %58 : memref<1x128x128xf32, #tpu.memory_space<vmem>> -> memref<128x128xf32, #tpu.memory_space<vmem>>
    %60 = tpu.memref_slice %arg5[%c1_i32_56] : memref<2x!tpu.dma_semaphore, #tpu.memory_space<semaphore_mem>> -> memref<1x!tpu.dma_semaphore, #tpu.memory_space<semaphore_mem>>
    %61 = tpu.memref_squeeze %60 : memref<1x!tpu.dma_semaphore, #tpu.memory_space<semaphore_mem>> -> memref<!tpu.dma_semaphore, #tpu.memory_space<semaphore_mem>>
    tpu.enqueue_dma source(%57 : memref<128x128xf32, #tpu.memory_space<any>>) target(%59 : memref<128x128xf32, #tpu.memory_space<vmem>>) target_semaphore(%61 : memref<!tpu.dma_semaphore, #tpu.memory_space<semaphore_mem>>)
    %c0_61 = arith.constant 0 : index
    %c0_62 = arith.constant 0 : index
    %c0_63 = arith.constant 0 : index
    %62 = vector.load %arg4[%c0_61, %c0_62, %c0_63] : memref<2x128x128xf32, #tpu.memory_space<vmem>>, vector<1x128x128xf32>
    %63 = vector.shape_cast %62 : vector<1x128x128xf32> to vector<128x128xf32>
    %cst_64 = arith.constant dense<0.000000e+00> : vector<8x128xf32>
    %64 = tpu.matmul %49, %63, %cst_64 {dimension_numbers = #tpu.dot_dimension_numbers<[1], [0], [0], [1], [0, 0, 1, 1], [], []>} : vector<8x128xf32>, vector<128x128xf32>, vector<8x128xf32> -> vector<8x128xf32>
    %c2 = arith.constant 2 : index
    %c0_65 = arith.constant 0 : index
    %c0_66 = arith.constant 0 : index
    %65 = vector.load %arg1[%c2, %c0_65, %c0_66] : memref<8x1x128xf32, #tpu.memory_space<vmem>>, vector<1x1x128xf32>
    %66 = vector.shape_cast %65 : vector<1x1x128xf32> to vector<1x128xf32>
    %67 = vector.broadcast %66 : vector<1x128xf32> to vector<8x128xf32>
    %68 = arith.addf %64, %67 : vector<8x128xf32>
    %cst_67 = arith.constant 0.000000e+00 : f32
    %69 = vector.broadcast %cst_67 : f32 to vector<8x128xf32>
    %70 = arith.maximumf %68, %69 : vector<8x128xf32>
    %c0_i32_68 = arith.constant 0 : i32
    %c1_i32_69 = arith.constant 1 : i32
    %c1_i32_70 = arith.constant 1 : i32
    %c0_i32_71 = arith.constant 0 : i32
    %c0_i32_72 = arith.constant 0 : i32
    %71 = tpu.memref_slice %arg2[%c0_i32_68, %c0_i32_71, %c0_i32_72] : memref<8x128x128xf32, #tpu.memory_space<any>> -> memref<1x128x128xf32, #tpu.memory_space<any>>
    %72 = tpu.memref_squeeze %71 : memref<1x128x128xf32, #tpu.memory_space<any>> -> memref<128x128xf32, #tpu.memory_space<any>>
    %c0_i32_73 = arith.constant 0 : i32
    %c0_i32_74 = arith.constant 0 : i32
    %73 = tpu.memref_slice %arg4[%c1_i32_69, %c0_i32_73, %c0_i32_74] : memref<2x128x128xf32, #tpu.memory_space<vmem>> -> memref<1x128x128xf32, #tpu.memory_space<vmem>>
    %74 = tpu.memref_squeeze %73 : memref<1x128x128xf32, #tpu.memory_space<vmem>> -> memref<128x128xf32, #tpu.memory_space<vmem>>
    %75 = tpu.memref_slice %arg5[%c1_i32_70] : memref<2x!tpu.dma_semaphore, #tpu.memory_space<semaphore_mem>> -> memref<1x!tpu.dma_semaphore, #tpu.memory_space<semaphore_mem>>
    %76 = tpu.memref_squeeze %75 : memref<1x!tpu.dma_semaphore, #tpu.memory_space<semaphore_mem>> -> memref<!tpu.dma_semaphore, #tpu.memory_space<semaphore_mem>>
    tpu.wait_dma2 semaphore(%76 : memref<!tpu.dma_semaphore, #tpu.memory_space<semaphore_mem>>) src(%72 : memref<128x128xf32, #tpu.memory_space<any>>) dst(%74 : memref<128x128xf32, #tpu.memory_space<vmem>>)
    %c4_i32 = arith.constant 4 : i32
    %c0_i32_75 = arith.constant 0 : i32
    %c0_i32_76 = arith.constant 0 : i32
    %c0_i32_77 = arith.constant 0 : i32
    %c0_i32_78 = arith.constant 0 : i32
    %77 = tpu.memref_slice %arg2[%c4_i32, %c0_i32_77, %c0_i32_78] : memref<8x128x128xf32, #tpu.memory_space<any>> -> memref<1x128x128xf32, #tpu.memory_space<any>>
    %78 = tpu.memref_squeeze %77 : memref<1x128x128xf32, #tpu.memory_space<any>> -> memref<128x128xf32, #tpu.memory_space<any>>
    %c0_i32_79 = arith.constant 0 : i32
    %c0_i32_80 = arith.constant 0 : i32
    %79 = tpu.memref_slice %arg4[%c0_i32_75, %c0_i32_79, %c0_i32_80] : memref<2x128x128xf32, #tpu.memory_space<vmem>> -> memref<1x128x128xf32, #tpu.memory_space<vmem>>
    %80 = tpu.memref_squeeze %79 : memref<1x128x128xf32, #tpu.memory_space<vmem>> -> memref<128x128xf32, #tpu.memory_space<vmem>>
    %81 = tpu.memref_slice %arg5[%c0_i32_76] : memref<2x!tpu.dma_semaphore, #tpu.memory_space<semaphore_mem>> -> memref<1x!tpu.dma_semaphore, #tpu.memory_space<semaphore_mem>>
    %82 = tpu.memref_squeeze %81 : memref<1x!tpu.dma_semaphore, #tpu.memory_space<semaphore_mem>> -> memref<!tpu.dma_semaphore, #tpu.memory_space<semaphore_mem>>
    tpu.enqueue_dma source(%78 : memref<128x128xf32, #tpu.memory_space<any>>) target(%80 : memref<128x128xf32, #tpu.memory_space<vmem>>) target_semaphore(%82 : memref<!tpu.dma_semaphore, #tpu.memory_space<semaphore_mem>>)
    %c1_81 = arith.constant 1 : index
    %c0_82 = arith.constant 0 : index
    %c0_83 = arith.constant 0 : index
    %83 = vector.load %arg4[%c1_81, %c0_82, %c0_83] : memref<2x128x128xf32, #tpu.memory_space<vmem>>, vector<1x128x128xf32>
    %84 = vector.shape_cast %83 : vector<1x128x128xf32> to vector<128x128xf32>
    %cst_84 = arith.constant dense<0.000000e+00> : vector<8x128xf32>
    %85 = tpu.matmul %28, %84, %cst_84 {dimension_numbers = #tpu.dot_dimension_numbers<[1], [0], [0], [1], [0, 0, 1, 1], [], []>} : vector<8x128xf32>, vector<128x128xf32>, vector<8x128xf32> -> vector<8x128xf32>
    %c0_i32_85 = arith.constant 0 : i32
    %c0_i32_86 = arith.constant 0 : i32
    %c0_i32_87 = arith.constant 0 : i32
    %c0_i32_88 = arith.constant 0 : i32
    %c0_i32_89 = arith.constant 0 : i32
    %86 = tpu.memref_slice %arg2[%c0_i32_85, %c0_i32_88, %c0_i32_89] : memref<8x128x128xf32, #tpu.memory_space<any>> -> memref<1x128x128xf32, #tpu.memory_space<any>>
    %87 = tpu.memref_squeeze %86 : memref<1x128x128xf32, #tpu.memory_space<any>> -> memref<128x128xf32, #tpu.memory_space<any>>
    %c0_i32_90 = arith.constant 0 : i32
    %c0_i32_91 = arith.constant 0 : i32
    %88 = tpu.memref_slice %arg4[%c0_i32_86, %c0_i32_90, %c0_i32_91] : memref<2x128x128xf32, #tpu.memory_space<vmem>> -> memref<1x128x128xf32, #tpu.memory_space<vmem>>
    %89 = tpu.memref_squeeze %88 : memref<1x128x128xf32, #tpu.memory_space<vmem>> -> memref<128x128xf32, #tpu.memory_space<vmem>>
    %90 = tpu.memref_slice %arg5[%c0_i32_87] : memref<2x!tpu.dma_semaphore, #tpu.memory_space<semaphore_mem>> -> memref<1x!tpu.dma_semaphore, #tpu.memory_space<semaphore_mem>>
    %91 = tpu.memref_squeeze %90 : memref<1x!tpu.dma_semaphore, #tpu.memory_space<semaphore_mem>> -> memref<!tpu.dma_semaphore, #tpu.memory_space<semaphore_mem>>
    tpu.wait_dma2 semaphore(%91 : memref<!tpu.dma_semaphore, #tpu.memory_space<semaphore_mem>>) src(%87 : memref<128x128xf32, #tpu.memory_space<any>>) dst(%89 : memref<128x128xf32, #tpu.memory_space<vmem>>)
    %c5_i32 = arith.constant 5 : i32
    %c1_i32_92 = arith.constant 1 : i32
    %c1_i32_93 = arith.constant 1 : i32
    %c0_i32_94 = arith.constant 0 : i32
    %c0_i32_95 = arith.constant 0 : i32
    %92 = tpu.memref_slice %arg2[%c5_i32, %c0_i32_94, %c0_i32_95] : memref<8x128x128xf32, #tpu.memory_space<any>> -> memref<1x128x128xf32, #tpu.memory_space<any>>
    %93 = tpu.memref_squeeze %92 : memref<1x128x128xf32, #tpu.memory_space<any>> -> memref<128x128xf32, #tpu.memory_space<any>>
    %c0_i32_96 = arith.constant 0 : i32
    %c0_i32_97 = arith.constant 0 : i32
    %94 = tpu.memref_slice %arg4[%c1_i32_92, %c0_i32_96, %c0_i32_97] : memref<2x128x128xf32, #tpu.memory_space<vmem>> -> memref<1x128x128xf32, #tpu.memory_space<vmem>>
    %95 = tpu.memref_squeeze %94 : memref<1x128x128xf32, #tpu.memory_space<vmem>> -> memref<128x128xf32, #tpu.memory_space<vmem>>
    %96 = tpu.memref_slice %arg5[%c1_i32_93] : memref<2x!tpu.dma_semaphore, #tpu.memory_space<semaphore_mem>> -> memref<1x!tpu.dma_semaphore, #tpu.memory_space<semaphore_mem>>
    %97 = tpu.memref_squeeze %96 : memref<1x!tpu.dma_semaphore, #tpu.memory_space<semaphore_mem>> -> memref<!tpu.dma_semaphore, #tpu.memory_space<semaphore_mem>>
    tpu.enqueue_dma source(%93 : memref<128x128xf32, #tpu.memory_space<any>>) target(%95 : memref<128x128xf32, #tpu.memory_space<vmem>>) target_semaphore(%97 : memref<!tpu.dma_semaphore, #tpu.memory_space<semaphore_mem>>)
    %c0_98 = arith.constant 0 : index
    %c0_99 = arith.constant 0 : index
    %c0_100 = arith.constant 0 : index
    %98 = vector.load %arg4[%c0_98, %c0_99, %c0_100] : memref<2x128x128xf32, #tpu.memory_space<vmem>>, vector<1x128x128xf32>
    %99 = vector.shape_cast %98 : vector<1x128x128xf32> to vector<128x128xf32>
    %cst_101 = arith.constant dense<0.000000e+00> : vector<8x128xf32>
    %100 = tpu.matmul %70, %99, %cst_101 {dimension_numbers = #tpu.dot_dimension_numbers<[1], [0], [0], [1], [0, 0, 1, 1], [], []>} : vector<8x128xf32>, vector<128x128xf32>, vector<8x128xf32> -> vector<8x128xf32>
    %101 = arith.addf %85, %100 : vector<8x128xf32>
    %c4 = arith.constant 4 : index
    %c0_102 = arith.constant 0 : index
    %c0_103 = arith.constant 0 : index
    %102 = vector.load %arg1[%c4, %c0_102, %c0_103] : memref<8x1x128xf32, #tpu.memory_space<vmem>>, vector<1x1x128xf32>
    %103 = vector.shape_cast %102 : vector<1x1x128xf32> to vector<1x128xf32>
    %104 = vector.broadcast %103 : vector<1x128xf32> to vector<8x128xf32>
    %105 = arith.addf %101, %104 : vector<8x128xf32>
    %cst_104 = arith.constant 0.000000e+00 : f32
    %106 = vector.broadcast %cst_104 : f32 to vector<8x128xf32>
    %107 = arith.maximumf %105, %106 : vector<8x128xf32>
    %c0_i32_105 = arith.constant 0 : i32
    %c1_i32_106 = arith.constant 1 : i32
    %c1_i32_107 = arith.constant 1 : i32
    %c0_i32_108 = arith.constant 0 : i32
    %c0_i32_109 = arith.constant 0 : i32
    %108 = tpu.memref_slice %arg2[%c0_i32_105, %c0_i32_108, %c0_i32_109] : memref<8x128x128xf32, #tpu.memory_space<any>> -> memref<1x128x128xf32, #tpu.memory_space<any>>
    %109 = tpu.memref_squeeze %108 : memref<1x128x128xf32, #tpu.memory_space<any>> -> memref<128x128xf32, #tpu.memory_space<any>>
    %c0_i32_110 = arith.constant 0 : i32
    %c0_i32_111 = arith.constant 0 : i32
    %110 = tpu.memref_slice %arg4[%c1_i32_106, %c0_i32_110, %c0_i32_111] : memref<2x128x128xf32, #tpu.memory_space<vmem>> -> memref<1x128x128xf32, #tpu.memory_space<vmem>>
    %111 = tpu.memref_squeeze %110 : memref<1x128x128xf32, #tpu.memory_space<vmem>> -> memref<128x128xf32, #tpu.memory_space<vmem>>
    %112 = tpu.memref_slice %arg5[%c1_i32_107] : memref<2x!tpu.dma_semaphore, #tpu.memory_space<semaphore_mem>> -> memref<1x!tpu.dma_semaphore, #tpu.memory_space<semaphore_mem>>
    %113 = tpu.memref_squeeze %112 : memref<1x!tpu.dma_semaphore, #tpu.memory_space<semaphore_mem>> -> memref<!tpu.dma_semaphore, #tpu.memory_space<semaphore_mem>>
    tpu.wait_dma2 semaphore(%113 : memref<!tpu.dma_semaphore, #tpu.memory_space<semaphore_mem>>) src(%109 : memref<128x128xf32, #tpu.memory_space<any>>) dst(%111 : memref<128x128xf32, #tpu.memory_space<vmem>>)
    %c6_i32 = arith.constant 6 : i32
    %c0_i32_112 = arith.constant 0 : i32
    %c0_i32_113 = arith.constant 0 : i32
    %c0_i32_114 = arith.constant 0 : i32
    %c0_i32_115 = arith.constant 0 : i32
    %114 = tpu.memref_slice %arg2[%c6_i32, %c0_i32_114, %c0_i32_115] : memref<8x128x128xf32, #tpu.memory_space<any>> -> memref<1x128x128xf32, #tpu.memory_space<any>>
    %115 = tpu.memref_squeeze %114 : memref<1x128x128xf32, #tpu.memory_space<any>> -> memref<128x128xf32, #tpu.memory_space<any>>
    %c0_i32_116 = arith.constant 0 : i32
    %c0_i32_117 = arith.constant 0 : i32
    %116 = tpu.memref_slice %arg4[%c0_i32_112, %c0_i32_116, %c0_i32_117] : memref<2x128x128xf32, #tpu.memory_space<vmem>> -> memref<1x128x128xf32, #tpu.memory_space<vmem>>
    %117 = tpu.memref_squeeze %116 : memref<1x128x128xf32, #tpu.memory_space<vmem>> -> memref<128x128xf32, #tpu.memory_space<vmem>>
    %118 = tpu.memref_slice %arg5[%c0_i32_113] : memref<2x!tpu.dma_semaphore, #tpu.memory_space<semaphore_mem>> -> memref<1x!tpu.dma_semaphore, #tpu.memory_space<semaphore_mem>>
    %119 = tpu.memref_squeeze %118 : memref<1x!tpu.dma_semaphore, #tpu.memory_space<semaphore_mem>> -> memref<!tpu.dma_semaphore, #tpu.memory_space<semaphore_mem>>
    tpu.enqueue_dma source(%115 : memref<128x128xf32, #tpu.memory_space<any>>) target(%117 : memref<128x128xf32, #tpu.memory_space<vmem>>) target_semaphore(%119 : memref<!tpu.dma_semaphore, #tpu.memory_space<semaphore_mem>>)
    %c1_118 = arith.constant 1 : index
    %c0_119 = arith.constant 0 : index
    %c0_120 = arith.constant 0 : index
    %120 = vector.load %arg4[%c1_118, %c0_119, %c0_120] : memref<2x128x128xf32, #tpu.memory_space<vmem>>, vector<1x128x128xf32>
    %121 = vector.shape_cast %120 : vector<1x128x128xf32> to vector<128x128xf32>
    %cst_121 = arith.constant dense<0.000000e+00> : vector<8x128xf32>
    %122 = tpu.matmul %107, %121, %cst_121 {dimension_numbers = #tpu.dot_dimension_numbers<[1], [0], [0], [1], [0, 0, 1, 1], [], []>} : vector<8x128xf32>, vector<128x128xf32>, vector<8x128xf32> -> vector<8x128xf32>
    %c5 = arith.constant 5 : index
    %c0_122 = arith.constant 0 : index
    %c0_123 = arith.constant 0 : index
    %123 = vector.load %arg1[%c5, %c0_122, %c0_123] : memref<8x1x128xf32, #tpu.memory_space<vmem>>, vector<1x1x128xf32>
    %124 = vector.shape_cast %123 : vector<1x1x128xf32> to vector<1x128xf32>
    %125 = vector.broadcast %124 : vector<1x128xf32> to vector<8x128xf32>
    %126 = arith.addf %122, %125 : vector<8x128xf32>
    %cst_124 = arith.constant 0.000000e+00 : f32
    %127 = vector.broadcast %cst_124 : f32 to vector<8x128xf32>
    %128 = arith.maximumf %126, %127 : vector<8x128xf32>
    %c0_i32_125 = arith.constant 0 : i32
    %c0_i32_126 = arith.constant 0 : i32
    %c0_i32_127 = arith.constant 0 : i32
    %c0_i32_128 = arith.constant 0 : i32
    %c0_i32_129 = arith.constant 0 : i32
    %129 = tpu.memref_slice %arg2[%c0_i32_125, %c0_i32_128, %c0_i32_129] : memref<8x128x128xf32, #tpu.memory_space<any>> -> memref<1x128x128xf32, #tpu.memory_space<any>>
    %130 = tpu.memref_squeeze %129 : memref<1x128x128xf32, #tpu.memory_space<any>> -> memref<128x128xf32, #tpu.memory_space<any>>
    %c0_i32_130 = arith.constant 0 : i32
    %c0_i32_131 = arith.constant 0 : i32
    %131 = tpu.memref_slice %arg4[%c0_i32_126, %c0_i32_130, %c0_i32_131] : memref<2x128x128xf32, #tpu.memory_space<vmem>> -> memref<1x128x128xf32, #tpu.memory_space<vmem>>
    %132 = tpu.memref_squeeze %131 : memref<1x128x128xf32, #tpu.memory_space<vmem>> -> memref<128x128xf32, #tpu.memory_space<vmem>>
    %133 = tpu.memref_slice %arg5[%c0_i32_127] : memref<2x!tpu.dma_semaphore, #tpu.memory_space<semaphore_mem>> -> memref<1x!tpu.dma_semaphore, #tpu.memory_space<semaphore_mem>>
    %134 = tpu.memref_squeeze %133 : memref<1x!tpu.dma_semaphore, #tpu.memory_space<semaphore_mem>> -> memref<!tpu.dma_semaphore, #tpu.memory_space<semaphore_mem>>
    tpu.wait_dma2 semaphore(%134 : memref<!tpu.dma_semaphore, #tpu.memory_space<semaphore_mem>>) src(%130 : memref<128x128xf32, #tpu.memory_space<any>>) dst(%132 : memref<128x128xf32, #tpu.memory_space<vmem>>)
    %c7_i32 = arith.constant 7 : i32
    %c1_i32_132 = arith.constant 1 : i32
    %c1_i32_133 = arith.constant 1 : i32
    %c0_i32_134 = arith.constant 0 : i32
    %c0_i32_135 = arith.constant 0 : i32
    %135 = tpu.memref_slice %arg2[%c7_i32, %c0_i32_134, %c0_i32_135] : memref<8x128x128xf32, #tpu.memory_space<any>> -> memref<1x128x128xf32, #tpu.memory_space<any>>
    %136 = tpu.memref_squeeze %135 : memref<1x128x128xf32, #tpu.memory_space<any>> -> memref<128x128xf32, #tpu.memory_space<any>>
    %c0_i32_136 = arith.constant 0 : i32
    %c0_i32_137 = arith.constant 0 : i32
    %137 = tpu.memref_slice %arg4[%c1_i32_132, %c0_i32_136, %c0_i32_137] : memref<2x128x128xf32, #tpu.memory_space<vmem>> -> memref<1x128x128xf32, #tpu.memory_space<vmem>>
    %138 = tpu.memref_squeeze %137 : memref<1x128x128xf32, #tpu.memory_space<vmem>> -> memref<128x128xf32, #tpu.memory_space<vmem>>
    %139 = tpu.memref_slice %arg5[%c1_i32_133] : memref<2x!tpu.dma_semaphore, #tpu.memory_space<semaphore_mem>> -> memref<1x!tpu.dma_semaphore, #tpu.memory_space<semaphore_mem>>
    %140 = tpu.memref_squeeze %139 : memref<1x!tpu.dma_semaphore, #tpu.memory_space<semaphore_mem>> -> memref<!tpu.dma_semaphore, #tpu.memory_space<semaphore_mem>>
    tpu.enqueue_dma source(%136 : memref<128x128xf32, #tpu.memory_space<any>>) target(%138 : memref<128x128xf32, #tpu.memory_space<vmem>>) target_semaphore(%140 : memref<!tpu.dma_semaphore, #tpu.memory_space<semaphore_mem>>)
    %c0_138 = arith.constant 0 : index
    %c0_139 = arith.constant 0 : index
    %c0_140 = arith.constant 0 : index
    %141 = vector.load %arg4[%c0_138, %c0_139, %c0_140] : memref<2x128x128xf32, #tpu.memory_space<vmem>>, vector<1x128x128xf32>
    %142 = vector.shape_cast %141 : vector<1x128x128xf32> to vector<128x128xf32>
    %cst_141 = arith.constant dense<0.000000e+00> : vector<8x128xf32>
    %143 = tpu.matmul %128, %142, %cst_141 {dimension_numbers = #tpu.dot_dimension_numbers<[1], [0], [0], [1], [0, 0, 1, 1], [], []>} : vector<8x128xf32>, vector<128x128xf32>, vector<8x128xf32> -> vector<8x128xf32>
    %c6 = arith.constant 6 : index
    %c0_142 = arith.constant 0 : index
    %c0_143 = arith.constant 0 : index
    %144 = vector.load %arg1[%c6, %c0_142, %c0_143] : memref<8x1x128xf32, #tpu.memory_space<vmem>>, vector<1x1x128xf32>
    %145 = vector.shape_cast %144 : vector<1x1x128xf32> to vector<1x128xf32>
    %146 = vector.broadcast %145 : vector<1x128xf32> to vector<8x128xf32>
    %147 = arith.addf %143, %146 : vector<8x128xf32>
    %cst_144 = arith.constant 0.000000e+00 : f32
    %148 = vector.broadcast %cst_144 : f32 to vector<8x128xf32>
    %149 = arith.maximumf %147, %148 : vector<8x128xf32>
    %c0_i32_145 = arith.constant 0 : i32
    %c1_i32_146 = arith.constant 1 : i32
    %c1_i32_147 = arith.constant 1 : i32
    %c0_i32_148 = arith.constant 0 : i32
    %c0_i32_149 = arith.constant 0 : i32
    %150 = tpu.memref_slice %arg2[%c0_i32_145, %c0_i32_148, %c0_i32_149] : memref<8x128x128xf32, #tpu.memory_space<any>> -> memref<1x128x128xf32, #tpu.memory_space<any>>
    %151 = tpu.memref_squeeze %150 : memref<1x128x128xf32, #tpu.memory_space<any>> -> memref<128x128xf32, #tpu.memory_space<any>>
    %c0_i32_150 = arith.constant 0 : i32
    %c0_i32_151 = arith.constant 0 : i32
    %152 = tpu.memref_slice %arg4[%c1_i32_146, %c0_i32_150, %c0_i32_151] : memref<2x128x128xf32, #tpu.memory_space<vmem>> -> memref<1x128x128xf32, #tpu.memory_space<vmem>>
    %153 = tpu.memref_squeeze %152 : memref<1x128x128xf32, #tpu.memory_space<vmem>> -> memref<128x128xf32, #tpu.memory_space<vmem>>
    %154 = tpu.memref_slice %arg5[%c1_i32_147] : memref<2x!tpu.dma_semaphore, #tpu.memory_space<semaphore_mem>> -> memref<1x!tpu.dma_semaphore, #tpu.memory_space<semaphore_mem>>
    %155 = tpu.memref_squeeze %154 : memref<1x!tpu.dma_semaphore, #tpu.memory_space<semaphore_mem>> -> memref<!tpu.dma_semaphore, #tpu.memory_space<semaphore_mem>>
    tpu.wait_dma2 semaphore(%155 : memref<!tpu.dma_semaphore, #tpu.memory_space<semaphore_mem>>) src(%151 : memref<128x128xf32, #tpu.memory_space<any>>) dst(%153 : memref<128x128xf32, #tpu.memory_space<vmem>>)
    %c1_152 = arith.constant 1 : index
    %c0_153 = arith.constant 0 : index
    %c0_154 = arith.constant 0 : index
    %156 = vector.load %arg4[%c1_152, %c0_153, %c0_154] : memref<2x128x128xf32, #tpu.memory_space<vmem>>, vector<1x128x128xf32>
    %157 = vector.shape_cast %156 : vector<1x128x128xf32> to vector<128x128xf32>
    %cst_155 = arith.constant dense<0.000000e+00> : vector<8x128xf32>
    %158 = tpu.matmul %149, %157, %cst_155 {dimension_numbers = #tpu.dot_dimension_numbers<[1], [0], [0], [1], [0, 0, 1, 1], [], []>} : vector<8x128xf32>, vector<128x128xf32>, vector<8x128xf32> -> vector<8x128xf32>
    %c7 = arith.constant 7 : index
    %c0_156 = arith.constant 0 : index
    %c0_157 = arith.constant 0 : index
    %159 = vector.load %arg1[%c7, %c0_156, %c0_157] : memref<8x1x128xf32, #tpu.memory_space<vmem>>, vector<1x1x128xf32>
    %160 = vector.shape_cast %159 : vector<1x1x128xf32> to vector<1x128xf32>
    %161 = vector.broadcast %160 : vector<1x128xf32> to vector<8x128xf32>
    %162 = arith.addf %158, %161 : vector<8x128xf32>
    %163 = arith.negf %162 : vector<8x128xf32>
    %164 = math.exp %163 : vector<8x128xf32>
    %cst_158 = arith.constant 1.000000e+00 : f32
    %165 = vector.broadcast %cst_158 : f32 to vector<8x128xf32>
    %166 = arith.addf %165, %164 : vector<8x128xf32>
    %167 = arith.divf %165, %166 : vector<8x128xf32>
    %c1_159 = arith.constant 1 : index
    %c0_160 = arith.constant 0 : index
    %c0_161 = arith.constant 0 : index
    %168 = vector.load %arg0[%c1_159, %c0_160, %c0_161] : memref<3x8x128xf32, #tpu.memory_space<vmem>>, vector<1x8x128xf32>
    %169 = vector.shape_cast %168 : vector<1x8x128xf32> to vector<8x128xf32>
    %cst_162 = arith.constant 1.000000e+00 : f32
    %170 = vector.broadcast %cst_162 : f32 to vector<8x128xf32>
    %171 = arith.subf %170, %169 : vector<8x128xf32>
    %172 = arith.mulf %167, %171 : vector<8x128xf32>
    %c2_163 = arith.constant 2 : index
    %c0_164 = arith.constant 0 : index
    %c0_165 = arith.constant 0 : index
    %173 = vector.load %arg0[%c2_163, %c0_164, %c0_165] : memref<3x8x128xf32, #tpu.memory_space<vmem>>, vector<1x8x128xf32>
    %174 = vector.shape_cast %173 : vector<1x8x128xf32> to vector<8x128xf32>
    %175 = arith.mulf %174, %169 : vector<8x128xf32>
    %176 = arith.addf %172, %175 : vector<8x128xf32>
    %c0_166 = arith.constant 0 : index
    %c0_167 = arith.constant 0 : index
    %177 = vector.load %arg3[%c0_166, %c0_167] : memref<8x128xf32, #tpu.memory_space<vmem>>, vector<8x128xf32>
    tpu.vector_store %arg3[%c0_166, %c0_167], %176 {strides = array<i32>} : memref<8x128xf32, #tpu.memory_space<vmem>>, vector<8x128xf32>,
    return
  }
}

</mosaic_0001>

<bundles_post_ra>
// kernel: keygen_forward.1
= control target key start
LH: loop header
LB: loop body
LE: loop exit
PB: predicated region body
PF: predicated region fallthrough
CT: control target
= control target key end

     0   :  { %s1757_s12 = smov [#allocation2]   ;;  %s2106_s0 = inlined_call_operand.vmem [shape: f32[3,8,128], index: 0, kind: input, shape index: {}]   ;;  %s2107_s1 = inlined_call_operand.vmem [shape: f32[8,1,128], index: 1, kind: input, shape index: {}]   ;;  %s2108_s2 = inlined_call_operand.hbm [shape: f32[8,128,128], index: 2, kind: input, shape index: {}]   ;;  %s2109_s3 = inlined_call_operand.vmem [shape: f32[8,128], index: 3, kind: output, shape index: {}]  }
   0x1   :  { %s19_s13 = sshll.u32 %s1757_s12, 4  ;;  %v1785_v0 = vld [vmem:[%s2106_s0] sm:$0xff]  ;;  %s1792_s18 = scalar_lea.hbm %s2108_s2, 2048  ;;  %s1787_s13 = int_to_ptr.vmem [resolvable:$true] %s19_s13 }
   0x2   :  { %p1545_p0 = scmp.ne.s32.totalorder %s2108_s2, %s1792_s18  ;;  %s1801_s23 = scalar_lea.hbm %s2108_s2, 16384 }
   0x3   :  { %p1547_p1 = scmp.lt.u32.totalorder %s1801_s23, %s1792_s18  ;;  %p1548_p2 = scmp.lt.u32.totalorder %s1792_s18, %s2108_s2 }
   0x5   :  { %p1549_p3 = por %p1548_p2, %p1547_p1 }
   0x7   :  { %p1550_p4 = pnand %p1549_p3, %p1545_p0 }
   0x9   :  { %1553 = shalt.err (!%p1550_p4)  }
   0xa   :  { %s1554_s28 = scalar_lea.vmem %s1787_s13, 2048  ;;  %s1558_s29 = scalar_lea.vmem %s1787_s13, 4096 }
   0xb   :  { %p1555_p5 = scmp.ne.s32.totalorder %s1787_s13, %s1554_s28  ;;  %p1559_p6 = scmp.lt.s32.totalorder %s1787_s13, %s1787_s13 }
   0xc   :  { %p1560_p7 = scmp.lt.s32.totalorder %s1558_s29, %s1554_s28 }
   0xe   :  { %p1561_p8 = por %p1560_p7, %p1559_p6 }
  0x10   :  { %p1819_p9 = pnand %p1561_p8, %p1555_p5 }
  0x12   :  { %1565 = shalt.err (!%p1819_p9)  }
  0x13   :  { %22 = dma.hbm_to_vmem [thread:$0]  %s2108_s2, 2048, %s1787_s13, [#allocation3] }
  0x14   :  { %1741 = dma.done.wait [#allocation3], 2048 }
  0x15   :  { %1742 = vsyncadd [#allocation3], 4294965248  ;;  %s1758_s6 = smov [#allocation2 + $0x80]   ;;  %v1759_v1 = vmov 0.0|0.0   ;;  %vm1760_vm0 = vmmov 0   ;;  %v1761_v2 = vmov 0.0  }
  0x16   :  { %s37_s7 = sshll.u32 %s1758_s6, 4  ;;  %1343 = vmatprep.subr.bf16.mxu0 %v1759_v1  ;;  %1095 = vmatprep.mubr.msk.f32.mxu0 %vm1760_vm0, %v1761_v2  ;;  %s1837_s10 = scalar_lea.hbm %s2108_s2, 4096  ;;  %s1830_s7 = int_to_ptr.vmem [resolvable:$true] %s37_s7 }
  0x17   :  { %p1567_p10 = scmp.ne.s32.totalorder %s1792_s18, %s1837_s10  ;;  %p1570_p11 = scmp.lt.u32.totalorder %s1801_s23, %s1837_s10 }
  0x18   :  { %p1572_p13 = scmp.lt.u32.totalorder %s1837_s10, %s1792_s18 }
  0x19   :  { %p1571_p12 = por %p1570_p11, %p1548_p2 }
  0x1b   :  { %p1573_p0 = por %p1572_p13, %p1571_p12 }
  0x1d   :  { %p1574_p1 = pnand %p1573_p0, %p1567_p10 }
  0x1f   :  { %1577 = shalt.err (!%p1574_p1)  }
  0x20   :  { %s1578_s14 = scalar_lea.vmem %s1830_s7, 2048  ;;  %p1583_p4 = scmp.lt.s32.totalorder %s1830_s7, %s1787_s13 }
  0x21   :  { %p1579_p3 = scmp.ne.s32.totalorder %s1830_s7, %s1578_s14  ;;  %p1584_p5 = scmp.lt.s32.totalorder %s1558_s29, %s1578_s14 }
  0x23   :  { %p1585_p6 = por %p1584_p5, %p1583_p4 }
  0x25   :  { %p1854_p7 = pnand %p1585_p6, %p1579_p3 }
  0x27   :  { %1589 = shalt.err (!%p1854_p7)  }
  0x28   :  { %40 = dma.hbm_to_vmem [thread:$0]  %s1792_s18, 2048, %s1830_s7, [#allocation3 + $0x1]  ;;  %v909_v27 = vld [vmem:[%s2107_s1] ss:$0 sm:$0xff] }
  0x29   :  { %v41_v3 = vld [vmem:[#allocation2] sm:$0xff]  ;;  %v42_v4 = vld [vmem:[#allocation2 + $0x8] sm:$0xff]  ;;  %v43_v5 = vld [vmem:[#allocation2 + $0x10] sm:$0xff] }
  0x2a   :  { %v1344_v6 = vpack.c.bf16 %v42_v4, %v41_v3  ;;  %v44_v7 = vld [vmem:[#allocation2 + $0x18] sm:$0xff]  ;;  %v45_v9 = vld [vmem:[#allocation2 + $0x20] sm:$0xff]  ;;  %v46_v10 = vld [vmem:[#allocation2 + $0x28] sm:$0xff] }
  0x2b   :  { %v1347_v8 = vpack.c.bf16 %v44_v7, %v43_v5  ;;  %v1350_v11 = vpack.c.bf16 %v46_v10, %v45_v9  ;;  %v47_v12 = vld [vmem:[#allocation2 + $0x30] sm:$0xff]  ;;  %v48_v13 = vld [vmem:[#allocation2 + $0x38] sm:$0xff]  ;;  %v49_v15 = vld [vmem:[#allocation2 + $0x40] sm:$0xff] }
  0x2c   :  { %1345 = vmatpush3.bf16.msra.mxu0 %v1344_v6  ;;  %v1353_v14 = vpack.c.bf16 %v48_v13, %v47_v12  ;;  %v50_v16 = vld [vmem:[#allocation2 + $0x48] sm:$0xff]  ;;  %v51_v18 = vld [vmem:[#allocation2 + $0x50] sm:$0xff]  ;;  %v52_v19 = vld [vmem:[#allocation2 + $0x58] sm:$0xff] }
  0x2d   :  { %1346 = vmatprep.subr.bf16.mxu0 %v1759_v1  ;;  %v1356_v17 = vpack.c.bf16 %v50_v16, %v49_v15  ;;  %v1359_v20 = vpack.c.bf16 %v52_v19, %v51_v18  ;;  %v53_v21 = vld [vmem:[#allocation2 + $0x60] sm:$0xff]  ;;  %v54_v22 = vld [vmem:[#allocation2 + $0x68] sm:$0xff]  ;;  %v55_v24 = vld [vmem:[#allocation2 + $0x70] sm:$0xff] }
  0x2e   :  { %v1362_v23 = vpack.c.bf16 %v54_v22, %v53_v21  ;;  %v56_v25 = vld [vmem:[#allocation2 + $0x78] sm:$0xff] }
  0x2f   :  { %v1365_v26 = vpack.c.bf16 %v56_v25, %v55_v24 }
  0x30   :  { %1348 = vmatpush3.bf16.msra.mxu0 %v1347_v8 }
  0x31   :  { %1349 = vmatprep.subr.bf16.mxu0 %v1759_v1 }
  0x34   :  { %1351 = vmatpush3.bf16.msra.mxu0 %v1350_v11 }
  0x35   :  { %1352 = vmatprep.subr.bf16.mxu0 %v1759_v1 }
  0x38   :  { %1354 = vmatpush3.bf16.msra.mxu0 %v1353_v14 }
  0x39   :  { %1355 = vmatprep.subr.bf16.mxu0 %v1759_v1 }
  0x3c   :  { %1357 = vmatpush3.bf16.msra.mxu0 %v1356_v17 }
  0x3d   :  { %1358 = vmatprep.subr.bf16.mxu0 %v1759_v1 }
  0x40   :  { %1360 = vmatpush3.bf16.msra.mxu0 %v1359_v20 }
  0x41   :  { %1361 = vmatprep.subr.bf16.mxu0 %v1759_v1 }
  0x44   :  { %1363 = vmatpush3.bf16.msra.mxu0 %v1362_v23 }
  0x45   :  { %1364 = vmatprep.subr.bf16.mxu0 %v1759_v1 }
  0x48   :  { %1366 = vmatpush3.bf16.msra.mxu0 %v1365_v26 }
  0x4b   :  { %1096 = vmatmul.mubr.f32.vlgmr.msra.gmra.mrb[0].mxu0 %v1785_v0 }
 0x11e   :  { %v130_v28 = vpop.f32.mrb[0].mxu0 }
 0x11f   :  { %v1873_v29 = vadd.f32 %v909_v27, %v130_v28  ;;  %v1097_v30 = vpop.f32.mrb[1].mxu0 }
 0x121   :  { %v134_v31 = vmax.f32 %v1873_v29, 0.0 }
 0x122   :  { %1743 = dma.done.wait [#allocation3 + $0x1], 2048 }
 0x123   :  { %1744 = vsyncadd [#allocation3 + $0x1], 4294965248  ;;  %1367 = vmatprep.subr.bf16.mxu1 %v1759_v1  ;;  %1130 = vmatprep.mubr.msk.f32.mxu1 %vm1760_vm0, %v1761_v2  ;;  %s1882_s20 = scalar_lea.hbm %s2108_s2, 6144  ;;  %p1594_p8 = scmp.lt.u32.totalorder %s1837_s10, %s2108_s2 }
 0x124   :  { %p1592_p2 = scmp.ne.s32.totalorder %s1837_s10, %s1882_s20  ;;  %p1595_p10 = scmp.lt.u32.totalorder %s1801_s23, %s1882_s20 }
 0x125   :  { %p1597_p12 = scmp.lt.u32.totalorder %s1882_s20, %s1837_s10 }
 0x126   :  { %p1596_p11 = por %p1595_p10, %p1594_p8 }
 0x128   :  { %p1598_p13 = por %p1597_p12, %p1596_p11 }
 0x12a   :  { %p1599_p0 = pnand %p1598_p13, %p1592_p2 }
 0x12c   :  { %1602 = shalt.err (!%p1599_p0)  }
 0x12d   :  { %1614 = shalt.err (!%p1819_p9)  }
 0x12e   :  { %148 = dma.hbm_to_vmem [thread:$0]  %s1837_s10, 2048, %s1787_s13, [#allocation3]  ;;  %v911_v56 = vld [vmem:[%s2107_s1 + $0x1] ss:$0 sm:$0xff] }
 0x12f   :  { %v149_v32 = vld [vmem:[#allocation2 + $0x80] sm:$0xff]  ;;  %v150_v33 = vld [vmem:[#allocation2 + $0x88] sm:$0xff]  ;;  %v151_v34 = vld [vmem:[#allocation2 + $0x90] sm:$0xff] }
 0x130   :  { %v1368_v35 = vpack.c.bf16 %v150_v33, %v149_v32  ;;  %v152_v36 = vld [vmem:[#allocation2 + $0x98] sm:$0xff]  ;;  %v153_v38 = vld [vmem:[#allocation2 + $0xa0] sm:$0xff]  ;;  %v154_v39 = vld [vmem:[#allocation2 + $0xa8] sm:$0xff] }
 0x131   :  { %v1371_v37 = vpack.c.bf16 %v152_v36, %v151_v34  ;;  %v1374_v40 = vpack.c.bf16 %v154_v39, %v153_v38  ;;  %v155_v41 = vld [vmem:[#allocation2 + $0xb0] sm:$0xff]  ;;  %v156_v42 = vld [vmem:[#allocation2 + $0xb8] sm:$0xff]  ;;  %v157_v44 = vld [vmem:[#allocation2 + $0xc0] sm:$0xff] }
 0x132   :  { %1369 = vmatpush3.bf16.msra.mxu1 %v1368_v35  ;;  %v1377_v43 = vpack.c.bf16 %v156_v42, %v155_v41  ;;  %v158_v45 = vld [vmem:[#allocation2 + $0xc8] sm:$0xff]  ;;  %v159_v47 = vld [vmem:[#allocation2 + $0xd0] sm:$0xff]  ;;  %v160_v48 = vld [vmem:[#allocation2 + $0xd8] sm:$0xff] }
 0x133   :  { %1370 = vmatprep.subr.bf16.mxu1 %v1759_v1  ;;  %v1380_v46 = vpack.c.bf16 %v158_v45, %v157_v44  ;;  %v1383_v49 = vpack.c.bf16 %v160_v48, %v159_v47  ;;  %v161_v50 = vld [vmem:[#allocation2 + $0xe0] sm:$0xff]  ;;  %v162_v51 = vld [vmem:[#allocation2 + $0xe8] sm:$0xff]  ;;  %v163_v53 = vld [vmem:[#allocation2 + $0xf0] sm:$0xff] }
 0x134   :  { %v1386_v52 = vpack.c.bf16 %v162_v51, %v161_v50  ;;  %v164_v54 = vld [vmem:[#allocation2 + $0xf8] sm:$0xff] }
 0x135   :  { %v1389_v55 = vpack.c.bf16 %v164_v54, %v163_v53 }
 0x136   :  { %1372 = vmatpush3.bf16.msra.mxu1 %v1371_v37 }
 0x137   :  { %1373 = vmatprep.subr.bf16.mxu1 %v1759_v1 }
 0x13a   :  { %1375 = vmatpush3.bf16.msra.mxu1 %v1374_v40 }
 0x13b   :  { %1376 = vmatprep.subr.bf16.mxu1 %v1759_v1 }
 0x13e   :  { %1378 = vmatpush3.bf16.msra.mxu1 %v1377_v43 }
 0x13f   :  { %1379 = vmatprep.subr.bf16.mxu1 %v1759_v1 }
 0x142   :  { %1381 = vmatpush3.bf16.msra.mxu1 %v1380_v46 }
 0x143   :  { %1382 = vmatprep.subr.bf16.mxu1 %v1759_v1 }
 0x146   :  { %1384 = vmatpush3.bf16.msra.mxu1 %v1383_v49 }
 0x147   :  { %1385 = vmatprep.subr.bf16.mxu1 %v1759_v1 }
 0x14a   :  { %1387 = vmatpush3.bf16.msra.mxu1 %v1386_v52 }
 0x14b   :  { %1388 = vmatprep.subr.bf16.mxu1 %v1759_v1 }
 0x14e   :  { %1390 = vmatpush3.bf16.msra.mxu1 %v1389_v55 }
 0x151   :  { %1131 = vmatmul.mubr.f32.vlgmr.msra.gmra.mrb[0].mxu1 %v1785_v0 }
 0x224   :  { %v239_v57 = vpop.f32.mrb[0].mxu1 }
 0x225   :  { %v240_v58 = vadd.f32 %v911_v56, %v239_v57  ;;  %v1132_v59 = vpop.f32.mrb[1].mxu1 }
 0x227   :  { %v243_v60 = vmax.f32 %v240_v58, 0.0 }
 0x228   :  { %1745 = dma.done.wait [#allocation3], 2048 }
 0x229   :  { %1746 = vsyncadd [#allocation3], 4294965248  ;;  %1391 = vmatprep.subr.bf16.mxu0 %v1759_v1  ;;  %1165 = vmatprep.mubr.msk.f32.mxu0 %vm1760_vm0, %v1761_v2  ;;  %s1915_s28 = scalar_lea.hbm %s2108_s2, 8192  ;;  %p1619_p3 = scmp.lt.u32.totalorder %s1882_s20, %s2108_s2 }
 0x22a   :  { %p1617_p1 = scmp.ne.s32.totalorder %s1882_s20, %s1915_s28  ;;  %p1620_p4 = scmp.lt.u32.totalorder %s1801_s23, %s1915_s28 }
 0x22b   :  { %p1622_p6 = scmp.lt.u32.totalorder %s1915_s28, %s1882_s20 }
 0x22c   :  { %p1621_p5 = por %p1620_p4, %p1619_p3 }
 0x22e   :  { %p1623_p2 = por %p1622_p6, %p1621_p5 }
 0x230   :  { %p1624_p8 = pnand %p1623_p2, %p1617_p1 }
 0x232   :  { %1627 = shalt.err (!%p1624_p8)  }
 0x233   :  { %1639 = shalt.err (!%p1854_p7)  }
 0x234   :  { %257 = dma.hbm_to_vmem [thread:$0]  %s1882_s20, 2048, %s1830_s7, [#allocation3 + $0x1]  ;;  %v913_v23 = vld [vmem:[%s2107_s1 + $0x2] ss:$0 sm:$0xff] }
 0x235   :  { %v258_v61 = vld [vmem:[#allocation2] sm:$0xff]  ;;  %v259_v62 = vld [vmem:[#allocation2 + $0x8] sm:$0xff]  ;;  %v260_v63 = vld [vmem:[#allocation2 + $0x10] sm:$0xff] }
 0x236   :  { %v1392_v0 = vpack.c.bf16 %v259_v62, %v258_v61  ;;  %v261_v3 = vld [vmem:[#allocation2 + $0x18] sm:$0xff]  ;;  %v262_v5 = vld [vmem:[#allocation2 + $0x20] sm:$0xff]  ;;  %v263_v6 = vld [vmem:[#allocation2 + $0x28] sm:$0xff] }
 0x237   :  { %v1395_v4 = vpack.c.bf16 %v261_v3, %v260_v63  ;;  %v1398_v7 = vpack.c.bf16 %v263_v6, %v262_v5  ;;  %v264_v8 = vld [vmem:[#allocation2 + $0x30] sm:$0xff]  ;;  %v265_v9 = vld [vmem:[#allocation2 + $0x38] sm:$0xff]  ;;  %v266_v11 = vld [vmem:[#allocation2 + $0x40] sm:$0xff] }
 0x238   :  { %1393 = vmatpush3.bf16.msra.mxu0 %v1392_v0  ;;  %v1401_v10 = vpack.c.bf16 %v265_v9, %v264_v8  ;;  %v267_v12 = vld [vmem:[#allocation2 + $0x48] sm:$0xff]  ;;  %v268_v14 = vld [vmem:[#allocation2 + $0x50] sm:$0xff]  ;;  %v269_v15 = vld [vmem:[#allocation2 + $0x58] sm:$0xff] }
 0x239   :  { %1394 = vmatprep.subr.bf16.mxu0 %v1759_v1  ;;  %v1404_v13 = vpack.c.bf16 %v267_v12, %v266_v11  ;;  %v1407_v16 = vpack.c.bf16 %v269_v15, %v268_v14  ;;  %v270_v17 = vld [vmem:[#allocation2 + $0x60] sm:$0xff]  ;;  %v271_v18 = vld [vmem:[#allocation2 + $0x68] sm:$0xff]  ;;  %v272_v20 = vld [vmem:[#allocation2 + $0x70] sm:$0xff] }
 0x23a   :  { %v1410_v19 = vpack.c.bf16 %v271_v18, %v270_v17  ;;  %v273_v21 = vld [vmem:[#allocation2 + $0x78] sm:$0xff] }
 0x23b   :  { %v1413_v22 = vpack.c.bf16 %v273_v21, %v272_v20 }
 0x23c   :  { %1396 = vmatpush3.bf16.msra.mxu0 %v1395_v4 }
 0x23d   :  { %1397 = vmatprep.subr.bf16.mxu0 %v1759_v1 }
 0x240   :  { %1399 = vmatpush3.bf16.msra.mxu0 %v1398_v7 }
 0x241   :  { %1400 = vmatprep.subr.bf16.mxu0 %v1759_v1 }
 0x244   :  { %1402 = vmatpush3.bf16.msra.mxu0 %v1401_v10 }
 0x245   :  { %1403 = vmatprep.subr.bf16.mxu0 %v1759_v1 }
 0x248   :  { %1405 = vmatpush3.bf16.msra.mxu0 %v1404_v13 }
 0x249   :  { %1406 = vmatprep.subr.bf16.mxu0 %v1759_v1 }
 0x24c   :  { %1408 = vmatpush3.bf16.msra.mxu0 %v1407_v16 }
 0x24d   :  { %1409 = vmatprep.subr.bf16.mxu0 %v1759_v1 }
 0x250   :  { %1411 = vmatpush3.bf16.msra.mxu0 %v1410_v19 }
 0x251   :  { %1412 = vmatprep.subr.bf16.mxu0 %v1759_v1 }
 0x254   :  { %1414 = vmatpush3.bf16.msra.mxu0 %v1413_v22 }
 0x257   :  { %1166 = vmatmul.mubr.f32.vlgmr.msra.gmra.mrb[2].mxu0 %v243_v60 }
 0x32a   :  { %v348_v24 = vpop.f32.mrb[2].mxu0 }
 0x32b   :  { %v1941_v25 = vadd.f32 %v913_v23, %v348_v24  ;;  %v1167_v26 = vpop.f32.mrb[3].mxu0 }
 0x32d   :  { %v352_v27 = vmax.f32 %v1941_v25, 0.0 }
 0x32e   :  { %1747 = dma.done.wait [#allocation3 + $0x1], 2048 }
 0x32f   :  { %1748 = vsyncadd [#allocation3 + $0x1], 4294965248  ;;  %s1947_s10 = scalar_lea.hbm %s2108_s2, 10240  ;;  %p1644_p11 = scmp.lt.u32.totalorder %s1915_s28, %s2108_s2 }
 0x330   :  { %p1642_p10 = scmp.ne.s32.totalorder %s1915_s28, %s1947_s10  ;;  %p1645_p12 = scmp.lt.u32.totalorder %s1801_s23, %s1947_s10 }
 0x331   :  { %p1647_p0 = scmp.lt.u32.totalorder %s1947_s10, %s1915_s28 }
 0x332   :  { %p1646_p13 = por %p1645_p12, %p1644_p11 }
 0x334   :  { %p1648_p1 = por %p1647_p0, %p1646_p13 }
 0x336   :  { %p1649_p3 = pnand %p1648_p1, %p1642_p10 }
 0x338   :  { %1652 = shalt.err (!%p1649_p3)  }
 0x339   :  { %1664 = shalt.err (!%p1819_p9)  }
 0x33a   :  { %366 = dma.hbm_to_vmem [thread:$0]  %s1915_s28, 2048, %s1787_s13, [#allocation3] }
 0x33b   :  { %v367_v28 = vld [vmem:[#allocation2 + $0x80] sm:$0xff]  ;;  %v368_v30 = vld [vmem:[#allocation2 + $0x88] sm:$0xff]  ;;  %v369_v32 = vld [vmem:[#allocation2 + $0x90] sm:$0xff] }
 0x33c   :  { %v370_v33 = vld [vmem:[#allocation2 + $0x98] sm:$0xff]  ;;  %v371_v34 = vld [vmem:[#allocation2 + $0xa0] sm:$0xff]  ;;  %v372_v35 = vld [vmem:[#allocation2 + $0xa8] sm:$0xff] }
 0x33d   :  { %v373_v36 = vld [vmem:[#allocation2 + $0xb0] sm:$0xff]  ;;  %v374_v37 = vld [vmem:[#allocation2 + $0xb8] sm:$0xff]  ;;  %v375_v38 = vld [vmem:[#allocation2 + $0xc0] sm:$0xff] }
 0x33e   :  { %v376_v39 = vld [vmem:[#allocation2 + $0xc8] sm:$0xff]  ;;  %v377_v40 = vld [vmem:[#allocation2 + $0xd0] sm:$0xff]  ;;  %v378_v41 = vld [vmem:[#allocation2 + $0xd8] sm:$0xff] }
 0x33f   :  { %v1963_v42 = vld [vmem:[#allocation2 + $0xe0] sm:$0xff]  ;;  %v1965_v43 = vld [vmem:[#allocation2 + $0xe8] sm:$0xff]  ;;  %v1967_v44 = vld [vmem:[#allocation2 + $0xf0] sm:$0xff] }
 0x340   :  { %v1969_v45 = vld [vmem:[#allocation2 + $0xf8] sm:$0xff] }
 0x341   :  { %1749 = dma.done.wait [#allocation3], 2048 }
 0x342   :  { %1750 = vsyncadd [#allocation3], 4294965248  ;;  %1439 = vmatprep.subr.bf16.mxu0 %v1759_v1  ;;  %1415 = vmatprep.subr.bf16.mxu1 %v1759_v1  ;;  %v1440_v46 = vpack.c.bf16 %v368_v30, %v367_v28  ;;  %s1976_s17 = scalar_lea.hbm %s2108_s2, 12288  ;;  %p1669_p5 = scmp.lt.u32.totalorder %s1947_s10, %s2108_s2 }
 0x343   :  { %p1667_p4 = scmp.ne.s32.totalorder %s1947_s10, %s1976_s17  ;;  %p1670_p6 = scmp.lt.u32.totalorder %s1801_s23, %s1976_s17 }
 0x344   :  { %p1672_p8 = scmp.lt.u32.totalorder %s1976_s17, %s1947_s10 }
 0x345   :  { %p1671_p2 = por %p1670_p6, %p1669_p5 }
 0x347   :  { %p1673_p10 = por %p1672_p8, %p1671_p2 }
 0x349   :  { %p1674_p11 = pnand %p1673_p10, %p1667_p4 }
 0x34b   :  { %1677 = shalt.err (!%p1674_p11)  }
 0x34c   :  { %1689 = shalt.err (!%p1854_p7)  }
 0x34d   :  { %396 = dma.hbm_to_vmem [thread:$0]  %s1947_s10, 2048, %s1830_s7, [#allocation3 + $0x1]  ;;  %1235 = vmatprep.mubr.msk.f32.mxu0 %vm1760_vm0, %v1761_v2  ;;  %1441 = vmatpush3.bf16.msra.mxu0 %v1440_v46  ;;  %v1443_v47 = vpack.c.bf16 %v370_v33, %v369_v32  ;;  %v1446_v48 = vpack.c.bf16 %v372_v35, %v371_v34  ;;  %v1449_v54 = vpack.c.bf16 %v374_v37, %v373_v36  ;;  %v915_v19 = vld [vmem:[%s2107_s1 + $0x4] ss:$0 sm:$0xff] }
 0x34e   :  { %1200 = vmatprep.mubr.msk.f32.mxu1 %vm1760_vm0, %v1761_v2  ;;  %1442 = vmatprep.subr.bf16.mxu0 %v1759_v1  ;;  %v397_v49 = vld [vmem:[#allocation2] sm:$0xff]  ;;  %v398_v50 = vld [vmem:[#allocation2 + $0x8] sm:$0xff]  ;;  %v399_v51 = vld [vmem:[#allocation2 + $0x10] sm:$0xff]  ;;  %v1452_v58 = vpack.c.bf16 %v376_v39, %v375_v38  ;;  %v1455_v62 = vpack.c.bf16 %v378_v41, %v377_v40  ;;  %v1458_v4 = vpack.c.bf16 %v1965_v43, %v1963_v42 }
 0x34f   :  { %v1416_v52 = vpack.c.bf16 %v398_v50, %v397_v49  ;;  %v400_v53 = vld [vmem:[#allocation2 + $0x18] sm:$0xff]  ;;  %v401_v56 = vld [vmem:[#allocation2 + $0x20] sm:$0xff]  ;;  %v402_v57 = vld [vmem:[#allocation2 + $0x28] sm:$0xff]  ;;  %v1461_v8 = vpack.c.bf16 %v1969_v45, %v1967_v44 }
 0x350   :  { %v1419_v55 = vpack.c.bf16 %v400_v53, %v399_v51  ;;  %v1422_v59 = vpack.c.bf16 %v402_v57, %v401_v56  ;;  %v403_v60 = vld [vmem:[#allocation2 + $0x30] sm:$0xff]  ;;  %v404_v61 = vld [vmem:[#allocation2 + $0x38] sm:$0xff]  ;;  %v405_v0 = vld [vmem:[#allocation2 + $0x40] sm:$0xff] }
 0x351   :  { %1444 = vmatpush3.bf16.msra.mxu0 %v1443_v47  ;;  %1417 = vmatpush3.bf16.msra.mxu1 %v1416_v52  ;;  %v1425_v63 = vpack.c.bf16 %v404_v61, %v403_v60  ;;  %v406_v3 = vld [vmem:[#allocation2 + $0x48] sm:$0xff]  ;;  %v407_v6 = vld [vmem:[#allocation2 + $0x50] sm:$0xff]  ;;  %v408_v7 = vld [vmem:[#allocation2 + $0x58] sm:$0xff] }
 0x352   :  { %1445 = vmatprep.subr.bf16.mxu0 %v1759_v1  ;;  %1418 = vmatprep.subr.bf16.mxu1 %v1759_v1  ;;  %v1428_v5 = vpack.c.bf16 %v406_v3, %v405_v0  ;;  %v1431_v9 = vpack.c.bf16 %v408_v7, %v407_v6  ;;  %v409_v10 = vld [vmem:[#allocation2 + $0x60] sm:$0xff]  ;;  %v410_v11 = vld [vmem:[#allocation2 + $0x68] sm:$0xff]  ;;  %v411_v13 = vld [vmem:[#allocation2 + $0x70] sm:$0xff] }
 0x353   :  { %v1434_v12 = vpack.c.bf16 %v410_v11, %v409_v10  ;;  %v412_v14 = vld [vmem:[#allocation2 + $0x78] sm:$0xff] }
 0x354   :  { %v1437_v15 = vpack.c.bf16 %v412_v14, %v411_v13 }
 0x355   :  { %1447 = vmatpush3.bf16.msra.mxu0 %v1446_v48  ;;  %1420 = vmatpush3.bf16.msra.mxu1 %v1419_v55 }
 0x356   :  { %1448 = vmatprep.subr.bf16.mxu0 %v1759_v1  ;;  %1421 = vmatprep.subr.bf16.mxu1 %v1759_v1 }
 0x359   :  { %1450 = vmatpush3.bf16.msra.mxu0 %v1449_v54  ;;  %1423 = vmatpush3.bf16.msra.mxu1 %v1422_v59 }
 0x35a   :  { %1451 = vmatprep.subr.bf16.mxu0 %v1759_v1  ;;  %1424 = vmatprep.subr.bf16.mxu1 %v1759_v1 }
 0x35d   :  { %1453 = vmatpush3.bf16.msra.mxu0 %v1452_v58  ;;  %1426 = vmatpush3.bf16.msra.mxu1 %v1425_v63 }
 0x35e   :  { %1454 = vmatprep.subr.bf16.mxu0 %v1759_v1  ;;  %1427 = vmatprep.subr.bf16.mxu1 %v1759_v1 }
 0x361   :  { %1456 = vmatpush3.bf16.msra.mxu0 %v1455_v62  ;;  %1429 = vmatpush3.bf16.msra.mxu1 %v1428_v5 }
 0x362   :  { %1457 = vmatprep.subr.bf16.mxu0 %v1759_v1  ;;  %1430 = vmatprep.subr.bf16.mxu1 %v1759_v1 }
 0x365   :  { %1459 = vmatpush3.bf16.msra.mxu0 %v1458_v4  ;;  %1432 = vmatpush3.bf16.msra.mxu1 %v1431_v9 }
 0x366   :  { %1460 = vmatprep.subr.bf16.mxu0 %v1759_v1  ;;  %1433 = vmatprep.subr.bf16.mxu1 %v1759_v1 }
 0x369   :  { %1462 = vmatpush3.bf16.msra.mxu0 %v1461_v8  ;;  %1435 = vmatpush3.bf16.msra.mxu1 %v1434_v12 }
 0x36a   :  { %1436 = vmatprep.subr.bf16.mxu1 %v1759_v1 }
 0x36c   :  { %1236 = vmatmul.mubr.f32.vlgmr.msra.gmra.mrb[4].mxu0 %v134_v31 }
 0x36d   :  { %1438 = vmatpush3.bf16.msra.mxu1 %v1437_v15 }
 0x370   :  { %1201 = vmatmul.mubr.f32.vlgmr.msra.gmra.mrb[2].mxu1 %v352_v27 }
 0x43f   :  { %v549_v16 = vpop.f32.mrb[4].mxu0 }
 0x440   :  { %v1237_v17 = vpop.f32.mrb[5].mxu0 }
 0x443   :  { %v479_v18 = vpop.f32.mrb[2].mxu1 }
 0x444   :  { %v550_v20 = vadd.f32 %v549_v16, %v479_v18  ;;  %v1202_v21 = vpop.f32.mrb[3].mxu1 }
 0x446   :  { %v561_v22 = vadd.f32 %v915_v19, %v550_v20 }
 0x448   :  { %v562_v29 = vmax.f32 %v561_v22, 0.0 }
 0x449   :  { %1751 = dma.done.wait [#allocation3 + $0x1], 2048 }
 0x44a   :  { %1752 = vsyncadd [#allocation3 + $0x1], 4294965248  ;;  %1463 = vmatprep.subr.bf16.mxu1 %v1759_v1  ;;  %1270 = vmatprep.mubr.msk.f32.mxu1 %vm1760_vm0, %v1761_v2  ;;  %s2027_s25 = scalar_lea.hbm %s2108_s2, 14336  ;;  %p1694_p13 = scmp.lt.u32.totalorder %s1976_s17, %s2108_s2 }
 0x44b   :  { %p1692_p12 = scmp.ne.s32.totalorder %s1976_s17, %s2027_s25  ;;  %p1695_p0 = scmp.lt.u32.totalorder %s1801_s23, %s2027_s25 }
 0x44c   :  { %p1697_p3 = scmp.lt.u32.totalorder %s2027_s25, %s1976_s17 }
 0x44d   :  { %p1696_p1 = por %p1695_p0, %p1694_p13 }
 0x44f   :  { %p1698_p4 = por %p1697_p3, %p1696_p1 }
 0x451   :  { %p1699_p5 = pnand %p1698_p4, %p1692_p12 }
 0x453   :  { %1702 = shalt.err (!%p1699_p5)  }
 0x454   :  { %1714 = shalt.err (!%p1819_p9)  }
 0x455   :  { %576 = dma.hbm_to_vmem [thread:$0]  %s1976_s17, 2048, %s1787_s13, [#allocation3]  ;;  %v917_v48 = vld [vmem:[%s2107_s1 + $0x5] ss:$0 sm:$0xff] }
 0x456   :  { %v577_v31 = vld [vmem:[#allocation2 + $0x80] sm:$0xff]  ;;  %v578_v23 = vld [vmem:[#allocation2 + $0x88] sm:$0xff]  ;;  %v579_v24 = vld [vmem:[#allocation2 + $0x90] sm:$0xff] }
 0x457   :  { %v1464_v25 = vpack.c.bf16 %v578_v23, %v577_v31  ;;  %v580_v26 = vld [vmem:[#allocation2 + $0x98] sm:$0xff]  ;;  %v581_v28 = vld [vmem:[#allocation2 + $0xa0] sm:$0xff]  ;;  %v582_v30 = vld [vmem:[#allocation2 + $0xa8] sm:$0xff] }
 0x458   :  { %v1467_v27 = vpack.c.bf16 %v580_v26, %v579_v24  ;;  %v1470_v32 = vpack.c.bf16 %v582_v30, %v581_v28  ;;  %v583_v33 = vld [vmem:[#allocation2 + $0xb0] sm:$0xff]  ;;  %v584_v34 = vld [vmem:[#allocation2 + $0xb8] sm:$0xff]  ;;  %v585_v36 = vld [vmem:[#allocation2 + $0xc0] sm:$0xff] }
 0x459   :  { %1465 = vmatpush3.bf16.msra.mxu1 %v1464_v25  ;;  %v1473_v35 = vpack.c.bf16 %v584_v34, %v583_v33  ;;  %v586_v37 = vld [vmem:[#allocation2 + $0xc8] sm:$0xff]  ;;  %v587_v39 = vld [vmem:[#allocation2 + $0xd0] sm:$0xff]  ;;  %v588_v40 = vld [vmem:[#allocation2 + $0xd8] sm:$0xff] }
 0x45a   :  { %1466 = vmatprep.subr.bf16.mxu1 %v1759_v1  ;;  %v1476_v38 = vpack.c.bf16 %v586_v37, %v585_v36  ;;  %v1479_v41 = vpack.c.bf16 %v588_v40, %v587_v39  ;;  %v589_v42 = vld [vmem:[#allocation2 + $0xe0] sm:$0xff]  ;;  %v590_v43 = vld [vmem:[#allocation2 + $0xe8] sm:$0xff]  ;;  %v591_v45 = vld [vmem:[#allocation2 + $0xf0] sm:$0xff] }
 0x45b   :  { %v1482_v44 = vpack.c.bf16 %v590_v43, %v589_v42  ;;  %v592_v46 = vld [vmem:[#allocation2 + $0xf8] sm:$0xff] }
 0x45c   :  { %v1485_v47 = vpack.c.bf16 %v592_v46, %v591_v45 }
 0x45d   :  { %1468 = vmatpush3.bf16.msra.mxu1 %v1467_v27 }
 0x45e   :  { %1469 = vmatprep.subr.bf16.mxu1 %v1759_v1 }
 0x461   :  { %1471 = vmatpush3.bf16.msra.mxu1 %v1470_v32 }
 0x462   :  { %1472 = vmatprep.subr.bf16.mxu1 %v1759_v1 }
 0x465   :  { %1474 = vmatpush3.bf16.msra.mxu1 %v1473_v35 }
 0x466   :  { %1475 = vmatprep.subr.bf16.mxu1 %v1759_v1 }
 0x469   :  { %1477 = vmatpush3.bf16.msra.mxu1 %v1476_v38 }
 0x46a   :  { %1478 = vmatprep.subr.bf16.mxu1 %v1759_v1 }
 0x46d   :  { %1480 = vmatpush3.bf16.msra.mxu1 %v1479_v41 }
 0x46e   :  { %1481 = vmatprep.subr.bf16.mxu1 %v1759_v1 }
 0x471   :  { %1483 = vmatpush3.bf16.msra.mxu1 %v1482_v44 }
 0x472   :  { %1484 = vmatprep.subr.bf16.mxu1 %v1759_v1 }
 0x475   :  { %1486 = vmatpush3.bf16.msra.mxu1 %v1485_v47 }
 0x478   :  { %1271 = vmatmul.mubr.f32.vlgmr.msra.gmra.mrb[4].mxu1 %v562_v29 }
 0x54b   :  { %v667_v49 = vpop.f32.mrb[4].mxu1 }
 0x54c   :  { %v668_v50 = vadd.f32 %v917_v48, %v667_v49  ;;  %v1272_v51 = vpop.f32.mrb[5].mxu1 }
 0x54e   :  { %v671_v52 = vmax.f32 %v668_v50, 0.0 }
 0x54f   :  { %1753 = dma.done.wait [#allocation3], 2048 }
 0x550   :  { %1754 = vsyncadd [#allocation3], 4294965248  ;;  %1487 = vmatprep.subr.bf16.mxu0 %v1759_v1  ;;  %1305 = vmatprep.mubr.msk.f32.mxu0 %vm1760_vm0, %v1761_v2  ;;  %p1717_p9 = scmp.ne.s32.totalorder %s2027_s25, %s1801_s23  ;;  %p1719_p6 = scmp.lt.u32.totalorder %s2027_s25, %s2108_s2 }
 0x551   :  { %p1720_p2 = scmp.lt.u32.totalorder %s1801_s23, %s1801_s23 }
 0x553   :  { %p1721_p8 = por %p1720_p2, %p1719_p6 }
 0x555   :  { %p1723_p10 = por %p1721_p8, %p1695_p0 }
 0x557   :  { %p1724_p11 = pnand %p1723_p10, %p1717_p9 }
 0x559   :  { %1727 = shalt.err (!%p1724_p11)  }
 0x55a   :  { %1739 = shalt.err (!%p1854_p7)  }
 0x55b   :  { %685 = dma.hbm_to_vmem [thread:$0]  %s2027_s25, 2048, %s1830_s7, [#allocation3 + $0x1]  ;;  %v919_v15 = vld [vmem:[%s2107_s1 + $0x6] ss:$0 sm:$0xff] }
 0x55c   :  { %v686_v53 = vld [vmem:[#allocation2] sm:$0xff]  ;;  %v687_v54 = vld [vmem:[#allocation2 + $0x8] sm:$0xff]  ;;  %v688_v55 = vld [vmem:[#allocation2 + $0x10] sm:$0xff] }
 0x55d   :  { %v1488_v56 = vpack.c.bf16 %v687_v54, %v686_v53  ;;  %v689_v57 = vld [vmem:[#allocation2 + $0x18] sm:$0xff]  ;;  %v690_v59 = vld [vmem:[#allocation2 + $0x20] sm:$0xff]  ;;  %v691_v60 = vld [vmem:[#allocation2 + $0x28] sm:$0xff] }
 0x55e   :  { %v1491_v58 = vpack.c.bf16 %v689_v57, %v688_v55  ;;  %v1494_v61 = vpack.c.bf16 %v691_v60, %v690_v59  ;;  %v692_v62 = vld [vmem:[#allocation2 + $0x30] sm:$0xff]  ;;  %v693_v63 = vld [vmem:[#allocation2 + $0x38] sm:$0xff]  ;;  %v694_v3 = vld [vmem:[#allocation2 + $0x40] sm:$0xff] }
 0x55f   :  { %1489 = vmatpush3.bf16.msra.mxu0 %v1488_v56  ;;  %v1497_v0 = vpack.c.bf16 %v693_v63, %v692_v62  ;;  %v695_v4 = vld [vmem:[#allocation2 + $0x48] sm:$0xff]  ;;  %v696_v6 = vld [vmem:[#allocation2 + $0x50] sm:$0xff]  ;;  %v697_v7 = vld [vmem:[#allocation2 + $0x58] sm:$0xff] }
 0x560   :  { %1490 = vmatprep.subr.bf16.mxu0 %v1759_v1  ;;  %v1500_v5 = vpack.c.bf16 %v695_v4, %v694_v3  ;;  %v1503_v8 = vpack.c.bf16 %v697_v7, %v696_v6  ;;  %v698_v9 = vld [vmem:[#allocation2 + $0x60] sm:$0xff]  ;;  %v699_v10 = vld [vmem:[#allocation2 + $0x68] sm:$0xff]  ;;  %v700_v12 = vld [vmem:[#allocation2 + $0x70] sm:$0xff] }
 0x561   :  { %v1506_v11 = vpack.c.bf16 %v699_v10, %v698_v9  ;;  %v701_v13 = vld [vmem:[#allocation2 + $0x78] sm:$0xff] }
 0x562   :  { %v1509_v14 = vpack.c.bf16 %v701_v13, %v700_v12 }
 0x563   :  { %1492 = vmatpush3.bf16.msra.mxu0 %v1491_v58 }
 0x564   :  { %1493 = vmatprep.subr.bf16.mxu0 %v1759_v1 }
 0x567   :  { %1495 = vmatpush3.bf16.msra.mxu0 %v1494_v61 }
 0x568   :  { %1496 = vmatprep.subr.bf16.mxu0 %v1759_v1 }
 0x56b   :  { %1498 = vmatpush3.bf16.msra.mxu0 %v1497_v0 }
 0x56c   :  { %1499 = vmatprep.subr.bf16.mxu0 %v1759_v1 }
 0x56f   :  { %1501 = vmatpush3.bf16.msra.mxu0 %v1500_v5 }
 0x570   :  { %1502 = vmatprep.subr.bf16.mxu0 %v1759_v1 }
 0x573   :  { %1504 = vmatpush3.bf16.msra.mxu0 %v1503_v8 }
 0x574   :  { %1505 = vmatprep.subr.bf16.mxu0 %v1759_v1 }
 0x577   :  { %1507 = vmatpush3.bf16.msra.mxu0 %v1506_v11 }
 0x578   :  { %1508 = vmatprep.subr.bf16.mxu0 %v1759_v1 }
 0x57b   :  { %1510 = vmatpush3.bf16.msra.mxu0 %v1509_v14 }
 0x57e   :  { %1306 = vmatmul.mubr.f32.vlgmr.msra.gmra.mrb[6].mxu0 %v671_v52 }
 0x651   :  { %v776_v16 = vpop.f32.mrb[6].mxu0 }
 0x652   :  { %v777_v17 = vadd.f32 %v919_v15, %v776_v16  ;;  %v1307_v18 = vpop.f32.mrb[7].mxu0 }
 0x654   :  { %v780_v19 = vmax.f32 %v777_v17, 0.0 }
 0x655   :  { %1755 = dma.done.wait [#allocation3 + $0x1], 2048 }
 0x656   :  { %1756 = vsyncadd [#allocation3 + $0x1], 4294965248  ;;  %1511 = vmatprep.subr.bf16.mxu1 %v1759_v1  ;;  %1340 = vmatprep.mubr.msk.f32.mxu1 %vm1760_vm0, %v1761_v2  ;;  %v783_v20 = vld [vmem:[#allocation2 + $0x80] sm:$0xff]  ;;  %v784_v21 = vld [vmem:[#allocation2 + $0x88] sm:$0xff] }
 0x657   :  { %v785_v22 = vld [vmem:[#allocation2 + $0x90] sm:$0xff]  ;;  %v1512_v29 = vpack.c.bf16 %v784_v21, %v783_v20  ;;  %v786_v31 = vld [vmem:[#allocation2 + $0x98] sm:$0xff]  ;;  %v787_v24 = vld [vmem:[#allocation2 + $0xa0] sm:$0xff] }
 0x658   :  { %v1515_v23 = vpack.c.bf16 %v786_v31, %v785_v22  ;;  %v788_v25 = vld [vmem:[#allocation2 + $0xa8] sm:$0xff]  ;;  %v789_v27 = vld [vmem:[#allocation2 + $0xb0] sm:$0xff]  ;;  %v790_v28 = vld [vmem:[#allocation2 + $0xb8] sm:$0xff] }
 0x659   :  { %1513 = vmatpush3.bf16.msra.mxu1 %v1512_v29  ;;  %v1518_v26 = vpack.c.bf16 %v788_v25, %v787_v24  ;;  %v1521_v30 = vpack.c.bf16 %v790_v28, %v789_v27  ;;  %v791_v2 = vld [vmem:[#allocation2 + $0xc0] sm:$0xff]  ;;  %v792_v32 = vld [vmem:[#allocation2 + $0xc8] sm:$0xff]  ;;  %v793_v34 = vld [vmem:[#allocation2 + $0xd0] sm:$0xff] }
 0x65a   :  { %1514 = vmatprep.subr.bf16.mxu1 %v1759_v1  ;;  %v1524_v33 = vpack.c.bf16 %v792_v32, %v791_v2  ;;  %v794_v35 = vld [vmem:[#allocation2 + $0xd8] sm:$0xff]  ;;  %v795_v37 = vld [vmem:[#allocation2 + $0xe0] sm:$0xff]  ;;  %v796_v38 = vld [vmem:[#allocation2 + $0xe8] sm:$0xff] }
 0x65b   :  { %v1527_v36 = vpack.c.bf16 %v794_v35, %v793_v34  ;;  %v1530_v39 = vpack.c.bf16 %v796_v38, %v795_v37  ;;  %v797_v40 = vld [vmem:[#allocation2 + $0xf0] sm:$0xff]  ;;  %v798_v41 = vld [vmem:[#allocation2 + $0xf8] sm:$0xff]  ;;  %v921_v43 = vld [vmem:[%s2107_s1 + $0x7] ss:$0 sm:$0xff] }
 0x65c   :  { %v1533_v42 = vpack.c.bf16 %v798_v41, %v797_v40  ;;  %v923_v50 = vld [vmem:[%s2106_s0 + $0x8] sm:$0xff] }
 0x65d   :  { %1516 = vmatpush3.bf16.msra.mxu1 %v1515_v23  ;;  %v885_v51 = vsub.f32 1.0, %v923_v50 }
 0x65e   :  { %1517 = vmatprep.subr.bf16.mxu1 %v1759_v1 }
 0x661   :  { %1519 = vmatpush3.bf16.msra.mxu1 %v1518_v26 }
 0x662   :  { %1520 = vmatprep.subr.bf16.mxu1 %v1759_v1 }
 0x665   :  { %1522 = vmatpush3.bf16.msra.mxu1 %v1521_v30 }
 0x666   :  { %1523 = vmatprep.subr.bf16.mxu1 %v1759_v1 }
 0x669   :  { %1525 = vmatpush3.bf16.msra.mxu1 %v1524_v33 }
 0x66a   :  { %1526 = vmatprep.subr.bf16.mxu1 %v1759_v1 }
 0x66d   :  { %1528 = vmatpush3.bf16.msra.mxu1 %v1527_v36 }
 0x66e   :  { %1529 = vmatprep.subr.bf16.mxu1 %v1759_v1 }
 0x671   :  { %1531 = vmatpush3.bf16.msra.mxu1 %v1530_v39 }
 0x672   :  { %1532 = vmatprep.subr.bf16.mxu1 %v1759_v1  ;;  %v924_v1 = vld [vmem:[%s2106_s0 + $0x10] sm:$0xff] }
 0x673   :  { %v889_v52 = vmul.f32 %v924_v1, %v923_v50 }
 0x675   :  { %1534 = vmatpush3.bf16.msra.mxu1 %v1533_v42 }
 0x678   :  { %1341 = vmatmul.mubr.f32.vlgmr.msra.gmra.mrb[6].mxu1 %v780_v19 }
 0x74b   :  { %v873_v44 = vpop.f32.mrb[6].mxu1 }
 0x74c   :  { %v874_v45 = vadd.f32 %v921_v43, %v873_v44  ;;  %v1342_v46 = vpop.f32.mrb[7].mxu1 }
 0x74e   :  { %v922_v47 = vmul.f32 -1.442695, %v874_v45 }
 0x750   :  { %1540 = vpow2.f32 %v922_v47 }
 0x75a   :  { %v1541_v48 = vpop.eup %1540 }
 0x75b   :  { %v880_v49 = vadd.f32 1.0, %v1541_v48 }
 0x75d   :  { %1542 = vrcp.f32 %v880_v49 }
 0x767   :  { %v1543_v53 = vpop.eup %1542 }
 0x768   :  { %v886_v54 = vmul.f32 %v1543_v53, %v885_v51 }
 0x76a   :  { %v890_v55 = vadd.f32 %v889_v52, %v886_v54 }
 0x76c   :  { %891 = vst [vmem:[%s2109_s3] sm:$0xff] %v890_v55 }
 0x76d   :  { %896 = vsyncmov [#allocation3] }
 0x770   :  { %s897_s10 = vpop.sfrf %896 }
 0x771   :  { %p925_p7 = scmp.ne.s32.totalorder %s897_s10, 0 }
 0x773   :  { %901 = shalt.err (%p925_p7)  }
 0x774   :  { %903 = vsyncmov [#allocation3 + $0x1] }
 0x777   :  { %s904_s11 = vpop.sfrf %903 }
 0x778   :  { %p926_p12 = scmp.ne.s32.totalorder %s904_s11, 0 }
 0x77a   :  { %908 = shalt.err (%p926_p12)  }

</bundles_post_ra>
